<compile_context>
chip_gen: v7x
topology: tpu7x:2x2x1
jax: 0.10.0
libtpu: 0.0.40
codegen_flags: <defaults>
</compile_context>

<pallas_src>
import functools

import jax
import jax.numpy as jnp
from jax.experimental import pallas as pl
from jax.experimental.pallas import tpu as pltpu


def _transform_kernel(c4_ref, s4_ref, c5_ref, s5_ref, up_ref, w_ref, b_ref,
                      o_ref, pad_ref, *, H, W, H2, W2):
    # c4/s4: (1, C, H*W)   c5/s5: (1, C, H2*W2)   up: (H2*W2, H*W)
    # w: (C, 9*C)          b: (C, 1)              o: (1, C, H*W)
    # pad_ref scratch: (C, H+2, W+2)
    C = c4_ref.shape[1]
    HW = H * W
    HW2 = H2 * W2
    eps = 1e-5

    def mean_std(x, hw):
        # one-pass stats: var = (sum(x^2) - hw*m^2) / (hw - 1)  (unbiased, eps before sqrt)
        s1 = jnp.sum(x, axis=1, keepdims=True)            # (C, 1) lane reduction
        s2 = jnp.sum(x * x, axis=1, keepdims=True)
        m = s1 * (1.0 / hw)
        var = (s2 - hw * m * m) * (1.0 / (hw - 1))
        return m, jnp.sqrt(var + eps)

    def adain(c, s, hw):
        cm, cs = mean_std(c, hw)
        sm, ss = mean_std(s, hw)
        return (c - cm) * (ss / cs) + sm                   # one divide per channel

    a4 = adain(c4_ref[0], s4_ref[0], HW)                   # (C, HW) lane-dense
    a5 = adain(c5_ref[0], s5_ref[0], HW2)                  # (C, HW2)

    # nearest-neighbour 2x upsample as a single MXU matmul with precomputed selection matrix
    up = jnp.dot(a5, up_ref[...], preferred_element_type=jnp.float32)   # (C, HW)

    x = a4 + up                                            # merged features, (C, HW)

    # ReflectionPad2d((1,1,1,1)): materialize the padded slab exactly once in VMEM scratch
    x2 = x.reshape(C, H, W)
    pad_ref[:, 1:H + 1, 1:W + 1] = x2
    pad_ref[:, 0:1, 1:W + 1] = x2[:, 1:2, :]               # top row    <- x row 1
    pad_ref[:, H + 1:H + 2, 1:W + 1] = x2[:, H - 2:H - 1, :]  # bottom row <- x row H-2
    pad_ref[:, :, 0:1] = pad_ref[:, :, 2:3]                # left col  (corners included)
    pad_ref[:, :, W + 1:W + 2] = pad_ref[:, :, W - 1:W]    # right col (corners included)

    # im2col: stack the 9 shifted taps -> (9*C, HW), then ONE fused conv matmul (K = 9*C)
    taps = jnp.concatenate(
        [pad_ref[:, ky:ky + H, kx:kx + W].reshape(C, HW)
         for ky in range(3) for kx in range(3)],
        axis=0)                                            # (9*C, HW)
    out = jnp.dot(w_ref[...], taps, preferred_element_type=jnp.float32)  # (C, HW)

    o_ref[0] = (out + b_ref[...]).astype(o_ref.dtype)      # bias (C,1) broadcasts over lanes


def transform_forward(content4_1, style4_1, content5_1, style5_1, weight, bias):
    N, C, H, W = content4_1.shape
    _, _, H2, W2 = content5_1.shape
    HW, HW2 = H * W, H2 * W2

    # lane-dense flat layouts: (N, C, H*W) — C on sublanes, H*W on the 128-lane axis
    c4 = content4_1.reshape(N, C, HW)
    s4 = style4_1.reshape(N, C, HW)
    c5 = content5_1.reshape(N, C, HW2)
    s5 = style5_1.reshape(N, C, HW2)

    # nearest-2x upsample selection matrix, hoisted out of the kernel:
    # U[p, q] = 1  iff  p == (h//2)*W2 + (w//2)  with  q = h*W + w
    src = ((jnp.arange(H)[:, None] // 2) * W2 + (jnp.arange(W)[None, :] // 2)).reshape(HW)
    U = (jnp.arange(HW2)[:, None] == src[None, :]).astype(jnp.float32)   # (HW2, HW)

    # conv weight OIHW -> (Cout, 9*Cin), column order (ky*3+kx)*C + ci, matching tap stacking
    wf = jnp.transpose(weight, (0, 2, 3, 1)).reshape(C, 9 * C)
    b2 = bias.reshape(C, 1)

    kernel = functools.partial(_transform_kernel, H=H, W=W, H2=H2, W2=W2)

    out_flat = pl.pallas_call(
        kernel,
        out_shape=jax.ShapeDtypeStruct((N, C, HW), jnp.float32),
        grid=(N,),
        in_specs=[
            pl.BlockSpec((1, C, HW), lambda n: (n, 0, 0)),
            pl.BlockSpec((1, C, HW), lambda n: (n, 0, 0)),
            pl.BlockSpec((1, C, HW2), lambda n: (n, 0, 0)),
            pl.BlockSpec((1, C, HW2), lambda n: (n, 0, 0)),
            pl.BlockSpec((HW2, HW), lambda n: (0, 0)),      # upsample matrix (grid-invariant)
            pl.BlockSpec((C, 9 * C), lambda n: (0, 0)),     # conv weight     (grid-invariant)
            pl.BlockSpec((C, 1), lambda n: (0, 0)),         # bias            (grid-invariant)
        ],
        out_specs=pl.BlockSpec((1, C, HW), lambda n: (n, 0, 0)),
        scratch_shapes=[pltpu.VMEM((C, H + 2, W + 2), jnp.float32)],
        compiler_params=pltpu.CompilerParams(
            dimension_semantics=("parallel",),
            vmem_limit_bytes=32 * 1024 * 1024,
        ),
    )(c4, s4, c5, s5, U, wf, b2)

    return out_flat.reshape(N, C, H, W)


def _reference_forward(c4, s4, c5, s5, weight, bias):
    """Pure-JAX reference matching the PyTorch module semantics."""
    def mean_std(x, eps=1e-5):
        n, c = x.shape[:2]
        xf = x.reshape(n, c, -1)
        m = jnp.mean(xf, axis=2).reshape(n, c, 1, 1)
        v = jnp.var(xf, axis=2, ddof=1).reshape(n, c, 1, 1) + eps
        return m, jnp.sqrt(v)

    def adain(c, s):
        cm, cs = mean_std(c)
        sm, ss = mean_std(s)
        return (c - cm) / cs * ss + sm

    a4 = adain(c4, s4)
    a5 = adain(c5, s5)
    up = jnp.repeat(jnp.repeat(a5, 2, axis=2), 2, axis=3)
    x = a4 + up
    xp = jnp.pad(x, ((0, 0), (0, 0), (1, 1), (1, 1)), mode="reflect")
    out = jax.lax.conv_general_dilated(
        xp, weight, window_strides=(1, 1), padding="VALID",
        dimension_numbers=("NCHW", "OIHW", "NCHW"))
    return out + bias[None, :, None, None]


if __name__ == "__main__":
    N, C = 2, 4
    H = W = 16          # relu4_1 feature resolution
    H5 = W5 = 8         # relu5_1 feature resolution (half)

    key = jax.random.PRNGKey(0)
    k1, k2, k3, k4, kw, kb = jax.random.split(key, 6)
    content4_1 = jax.random.normal(k1, (N, C, H, W), jnp.float32)
    style4_1 = jax.random.normal(k2, (N, C, H, W), jnp.float32)
    content5_1 = jax.random.normal(k3, (N, C, H5, W5), jnp.float32)
    style5_1 = jax.random.normal(k4, (N, C, H5, W5), jnp.float32)

    # deterministic synthetic conv parameters (merge_conv: Conv2d(C, C, 3, 3))
    weight = 0.1 * jax.random.normal(kw, (C, C, 3, 3), jnp.float32)
    bias = 0.1 * jax.random.normal(kb, (C,), jnp.float32)

    out = transform_forward(content4_1, style4_1, content5_1, style5_1, weight, bias)
    out = jax.block_until_ready(out)

    ref = _reference_forward(content4_1, style4_1, content5_1, style5_1, weight, bias)
    ref = jax.block_until_ready(ref)

    assert out.shape == (N, C, H, W)
    assert jnp.allclose(out, ref, atol=1e-4, rtol=1e-4), "mismatch vs. pure-JAX reference"

    print("KERNEL_OK")
</pallas_src>

<mosaic_0001>
module attributes {stable_mosaic.version = 11 : i64} {
  func.func @_transform_kernel(%arg0: i32, %arg1: memref<1x4x256xf32, #tpu.memory_space<vmem>>, %arg2: memref<1x4x256xf32, #tpu.memory_space<vmem>>, %arg3: memref<1x4x64xf32, #tpu.memory_space<vmem>>, %arg4: memref<1x4x64xf32, #tpu.memory_space<vmem>>, %arg5: memref<64x256xf32, #tpu.memory_space<vmem>>, %arg6: memref<4x36xf32, #tpu.memory_space<vmem>>, %arg7: memref<4x1xf32, #tpu.memory_space<vmem>>, %arg8: memref<1x4x256xf32, #tpu.memory_space<vmem>>, %arg9: memref<4x18x18xf32, #tpu.memory_space<vmem>>) attributes {dimension_semantics = [#tpu.dimension_semantics<parallel>], iteration_bounds = array<i64: 2>, scalar_prefetch = 0 : i64, scratch_operands = 1 : i64, tpu.core_type = #tpu.core_type<tc>, window_params = [{transform_indices = @transform_0, window_bounds = array<i64: 1, 4, 256>}, {transform_indices = @transform_1, window_bounds = array<i64: 1, 4, 256>}, {transform_indices = @transform_2, window_bounds = array<i64: 1, 4, 64>}, {transform_indices = @transform_3, window_bounds = array<i64: 1, 4, 64>}, {pipeline_mode = #tpu.pipeline_mode<synchronous>, transform_indices = @transform_4, window_bounds = array<i64: 64, 256>}, {pipeline_mode = #tpu.pipeline_mode<synchronous>, transform_indices = @transform_5, window_bounds = array<i64: 4, 36>}, {pipeline_mode = #tpu.pipeline_mode<synchronous>, transform_indices = @transform_6, window_bounds = array<i64: 4, 1>}, {transform_indices = @transform_7, window_bounds = array<i64: 1, 4, 256>}]} {
    %c0 = arith.constant 0 : index
    %c0_0 = arith.constant 0 : index
    %c0_1 = arith.constant 0 : index
    %0 = vector.load %arg1[%c0, %c0_0, %c0_1] : memref<1x4x256xf32, #tpu.memory_space<vmem>>, vector<1x4x256xf32>
    %1 = vector.shape_cast %0 : vector<1x4x256xf32> to vector<4x256xf32>
    %c0_2 = arith.constant 0 : index
    %c0_3 = arith.constant 0 : index
    %c0_4 = arith.constant 0 : index
    %2 = vector.load %arg2[%c0_2, %c0_3, %c0_4] : memref<1x4x256xf32, #tpu.memory_space<vmem>>, vector<1x4x256xf32>
    %3 = vector.shape_cast %2 : vector<1x4x256xf32> to vector<4x256xf32>
    %cst = arith.constant dense<0.000000e+00> : vector<4xf32>
    %4 = vector.multi_reduction <add>, %1, %cst [1] : vector<4x256xf32> to vector<4xf32>
    %5 = vector.shape_cast %4 : vector<4xf32> to vector<4x1xf32>
    %6 = arith.mulf %1, %1 : vector<4x256xf32>
    %cst_5 = arith.constant dense<0.000000e+00> : vector<4xf32>
    %7 = vector.multi_reduction <add>, %6, %cst_5 [1] : vector<4x256xf32> to vector<4xf32>
    %8 = vector.shape_cast %7 : vector<4xf32> to vector<4x1xf32>
    %cst_6 = arith.constant 3.906250e-03 : f32
    %9 = vector.broadcast %cst_6 : f32 to vector<4x1xf32>
    %10 = arith.mulf %5, %9 : vector<4x1xf32>
    %cst_7 = arith.constant 2.560000e+02 : f32
    %11 = vector.broadcast %cst_7 : f32 to vector<4x1xf32>
    %12 = arith.mulf %11, %10 : vector<4x1xf32>
    %13 = arith.mulf %12, %10 : vector<4x1xf32>
    %14 = arith.subf %8, %13 : vector<4x1xf32>
    %cst_8 = arith.constant 0.00392156886 : f32
    %15 = vector.broadcast %cst_8 : f32 to vector<4x1xf32>
    %16 = arith.mulf %14, %15 : vector<4x1xf32>
    %cst_9 = arith.constant 9.99999974E-6 : f32
    %17 = vector.broadcast %cst_9 : f32 to vector<4x1xf32>
    %18 = arith.addf %16, %17 : vector<4x1xf32>
    %19 = math.sqrt %18 : vector<4x1xf32>
    %cst_10 = arith.constant dense<0.000000e+00> : vector<4xf32>
    %20 = vector.multi_reduction <add>, %3, %cst_10 [1] : vector<4x256xf32> to vector<4xf32>
    %21 = vector.shape_cast %20 : vector<4xf32> to vector<4x1xf32>
    %22 = arith.mulf %3, %3 : vector<4x256xf32>
    %cst_11 = arith.constant dense<0.000000e+00> : vector<4xf32>
    %23 = vector.multi_reduction <add>, %22, %cst_11 [1] : vector<4x256xf32> to vector<4xf32>
    %24 = vector.shape_cast %23 : vector<4xf32> to vector<4x1xf32>
    %cst_12 = arith.constant 3.906250e-03 : f32
    %25 = vector.broadcast %cst_12 : f32 to vector<4x1xf32>
    %26 = arith.mulf %21, %25 : vector<4x1xf32>
    %cst_13 = arith.constant 2.560000e+02 : f32
    %27 = vector.broadcast %cst_13 : f32 to vector<4x1xf32>
    %28 = arith.mulf %27, %26 : vector<4x1xf32>
    %29 = arith.mulf %28, %26 : vector<4x1xf32>
    %30 = arith.subf %24, %29 : vector<4x1xf32>
    %cst_14 = arith.constant 0.00392156886 : f32
    %31 = vector.broadcast %cst_14 : f32 to vector<4x1xf32>
    %32 = arith.mulf %30, %31 : vector<4x1xf32>
    %cst_15 = arith.constant 9.99999974E-6 : f32
    %33 = vector.broadcast %cst_15 : f32 to vector<4x1xf32>
    %34 = arith.addf %32, %33 : vector<4x1xf32>
    %35 = math.sqrt %34 : vector<4x1xf32>
    %36 = vector.broadcast %10 : vector<4x1xf32> to vector<4x256xf32>
    %37 = arith.subf %1, %36 : vector<4x256xf32>
    %38 = arith.divf %35, %19 : vector<4x1xf32>
    %39 = vector.broadcast %38 : vector<4x1xf32> to vector<4x256xf32>
    %40 = arith.mulf %37, %39 : vector<4x256xf32>
    %41 = vector.broadcast %26 : vector<4x1xf32> to vector<4x256xf32>
    %42 = arith.addf %40, %41 : vector<4x256xf32>
    %c0_16 = arith.constant 0 : index
    %c0_17 = arith.constant 0 : index
    %c0_18 = arith.constant 0 : index
    %43 = vector.load %arg3[%c0_16, %c0_17, %c0_18] : memref<1x4x64xf32, #tpu.memory_space<vmem>>, vector<1x4x64xf32>
    %44 = vector.shape_cast %43 : vector<1x4x64xf32> to vector<4x64xf32>
    %c0_19 = arith.constant 0 : index
    %c0_20 = arith.constant 0 : index
    %c0_21 = arith.constant 0 : index
    %45 = vector.load %arg4[%c0_19, %c0_20, %c0_21] : memref<1x4x64xf32, #tpu.memory_space<vmem>>, vector<1x4x64xf32>
    %46 = vector.shape_cast %45 : vector<1x4x64xf32> to vector<4x64xf32>
    %cst_22 = arith.constant dense<0.000000e+00> : vector<4xf32>
    %47 = vector.multi_reduction <add>, %44, %cst_22 [1] : vector<4x64xf32> to vector<4xf32>
    %48 = vector.shape_cast %47 : vector<4xf32> to vector<4x1xf32>
    %49 = arith.mulf %44, %44 : vector<4x64xf32>
    %cst_23 = arith.constant dense<0.000000e+00> : vector<4xf32>
    %50 = vector.multi_reduction <add>, %49, %cst_23 [1] : vector<4x64xf32> to vector<4xf32>
    %51 = vector.shape_cast %50 : vector<4xf32> to vector<4x1xf32>
    %cst_24 = arith.constant 1.562500e-02 : f32
    %52 = vector.broadcast %cst_24 : f32 to vector<4x1xf32>
    %53 = arith.mulf %48, %52 : vector<4x1xf32>
    %cst_25 = arith.constant 6.400000e+01 : f32
    %54 = vector.broadcast %cst_25 : f32 to vector<4x1xf32>
    %55 = arith.mulf %54, %53 : vector<4x1xf32>
    %56 = arith.mulf %55, %53 : vector<4x1xf32>
    %57 = arith.subf %51, %56 : vector<4x1xf32>
    %cst_26 = arith.constant 0.0158730168 : f32
    %58 = vector.broadcast %cst_26 : f32 to vector<4x1xf32>
    %59 = arith.mulf %57, %58 : vector<4x1xf32>
    %cst_27 = arith.constant 9.99999974E-6 : f32
    %60 = vector.broadcast %cst_27 : f32 to vector<4x1xf32>
    %61 = arith.addf %59, %60 : vector<4x1xf32>
    %62 = math.sqrt %61 : vector<4x1xf32>
    %cst_28 = arith.constant dense<0.000000e+00> : vector<4xf32>
    %63 = vector.multi_reduction <add>, %46, %cst_28 [1] : vector<4x64xf32> to vector<4xf32>
    %64 = vector.shape_cast %63 : vector<4xf32> to vector<4x1xf32>
    %65 = arith.mulf %46, %46 : vector<4x64xf32>
    %cst_29 = arith.constant dense<0.000000e+00> : vector<4xf32>
    %66 = vector.multi_reduction <add>, %65, %cst_29 [1] : vector<4x64xf32> to vector<4xf32>
    %67 = vector.shape_cast %66 : vector<4xf32> to vector<4x1xf32>
    %cst_30 = arith.constant 1.562500e-02 : f32
    %68 = vector.broadcast %cst_30 : f32 to vector<4x1xf32>
    %69 = arith.mulf %64, %68 : vector<4x1xf32>
    %cst_31 = arith.constant 6.400000e+01 : f32
    %70 = vector.broadcast %cst_31 : f32 to vector<4x1xf32>
    %71 = arith.mulf %70, %69 : vector<4x1xf32>
    %72 = arith.mulf %71, %69 : vector<4x1xf32>
    %73 = arith.subf %67, %72 : vector<4x1xf32>
    %cst_32 = arith.constant 0.0158730168 : f32
    %74 = vector.broadcast %cst_32 : f32 to vector<4x1xf32>
    %75 = arith.mulf %73, %74 : vector<4x1xf32>
    %cst_33 = arith.constant 9.99999974E-6 : f32
    %76 = vector.broadcast %cst_33 : f32 to vector<4x1xf32>
    %77 = arith.addf %75, %76 : vector<4x1xf32>
    %78 = math.sqrt %77 : vector<4x1xf32>
    %79 = vector.broadcast %53 : vector<4x1xf32> to vector<4x64xf32>
    %80 = arith.subf %44, %79 : vector<4x64xf32>
    %81 = arith.divf %78, %62 : vector<4x1xf32>
    %82 = vector.broadcast %81 : vector<4x1xf32> to vector<4x64xf32>
    %83 = arith.mulf %80, %82 : vector<4x64xf32>
    %84 = vector.broadcast %69 : vector<4x1xf32> to vector<4x64xf32>
    %85 = arith.addf %83, %84 : vector<4x64xf32>
    %c0_34 = arith.constant 0 : index
    %c0_35 = arith.constant 0 : index
    %86 = vector.load %arg5[%c0_34, %c0_35] : memref<64x256xf32, #tpu.memory_space<vmem>>, vector<64x256xf32>
    %cst_36 = arith.constant dense<0.000000e+00> : vector<4x256xf32>
    %87 = tpu.matmul %85, %86, %cst_36 {dimension_numbers = #tpu.dot_dimension_numbers<[1], [0], [0], [1], [0, 0, 1, 1], [], []>} : vector<4x64xf32>, vector<64x256xf32>, vector<4x256xf32> -> vector<4x256xf32>
    %88 = arith.addf %42, %87 : vector<4x256xf32>
    %89 = vector.shape_cast %88 : vector<4x256xf32> to vector<4x16x16xf32>
    %c0_37 = arith.constant 0 : index
    %c1 = arith.constant 1 : index
    %c1_38 = arith.constant 1 : index
    %90 = vector.load %arg9[%c0_37, %c1, %c1_38] : memref<4x18x18xf32, #tpu.memory_space<vmem>>, vector<4x16x16xf32>
    tpu.vector_store %arg9[%c0_37, %c1, %c1_38], %89 {strides = array<i32>} : memref<4x18x18xf32, #tpu.memory_space<vmem>>, vector<4x16x16xf32>,
    %91 = vector.extract_strided_slice %89 {offsets = [0, 1, 0], sizes = [4, 1, 16], strides = [1, 1, 1]} : vector<4x16x16xf32> to vector<4x1x16xf32>
    %c0_39 = arith.constant 0 : index
    %c0_40 = arith.constant 0 : index
    %c1_41 = arith.constant 1 : index
    %92 = vector.load %arg9[%c0_39, %c0_40, %c1_41] : memref<4x18x18xf32, #tpu.memory_space<vmem>>, vector<4x1x16xf32>
    tpu.vector_store %arg9[%c0_39, %c0_40, %c1_41], %91 {strides = array<i32>} : memref<4x18x18xf32, #tpu.memory_space<vmem>>, vector<4x1x16xf32>,
    %93 = vector.extract_strided_slice %89 {offsets = [0, 14, 0], sizes = [4, 1, 16], strides = [1, 1, 1]} : vector<4x16x16xf32> to vector<4x1x16xf32>
    %c0_42 = arith.constant 0 : index
    %c17 = arith.constant 17 : index
    %c1_43 = arith.constant 1 : index
    %94 = vector.load %arg9[%c0_42, %c17, %c1_43] : memref<4x18x18xf32, #tpu.memory_space<vmem>>, vector<4x1x16xf32>
    tpu.vector_store %arg9[%c0_42, %c17, %c1_43], %93 {strides = array<i32>} : memref<4x18x18xf32, #tpu.memory_space<vmem>>, vector<4x1x16xf32>,
    %c0_44 = arith.constant 0 : index
    %c0_45 = arith.constant 0 : index
    %c2 = arith.constant 2 : index
    %95 = vector.load %arg9[%c0_44, %c0_45, %c2] : memref<4x18x18xf32, #tpu.memory_space<vmem>>, vector<4x18x1xf32>
    %c0_46 = arith.constant 0 : index
    %c0_47 = arith.constant 0 : index
    %c0_48 = arith.constant 0 : index
    %96 = vector.load %arg9[%c0_46, %c0_47, %c0_48] : memref<4x18x18xf32, #tpu.memory_space<vmem>>, vector<4x18x1xf32>
    tpu.vector_store %arg9[%c0_46, %c0_47, %c0_48], %95 {strides = array<i32>} : memref<4x18x18xf32, #tpu.memory_space<vmem>>, vector<4x18x1xf32>,
    %c0_49 = arith.constant 0 : index
    %c0_50 = arith.constant 0 : index
    %c15 = arith.constant 15 : index
    %97 = vector.load %arg9[%c0_49, %c0_50, %c15] : memref<4x18x18xf32, #tpu.memory_space<vmem>>, vector<4x18x1xf32>
    %c0_51 = arith.constant 0 : index
    %c0_52 = arith.constant 0 : index
    %c17_53 = arith.constant 17 : index
    %98 = vector.load %arg9[%c0_51, %c0_52, %c17_53] : memref<4x18x18xf32, #tpu.memory_space<vmem>>, vector<4x18x1xf32>
    tpu.vector_store %arg9[%c0_51, %c0_52, %c17_53], %97 {strides = array<i32>} : memref<4x18x18xf32, #tpu.memory_space<vmem>>, vector<4x18x1xf32>,
    %c0_54 = arith.constant 0 : index
    %c0_55 = arith.constant 0 : index
    %c0_56 = arith.constant 0 : index
    %99 = vector.load %arg9[%c0_54, %c0_55, %c0_56] : memref<4x18x18xf32, #tpu.memory_space<vmem>>, vector<4x16x16xf32>
    %100 = vector.shape_cast %99 : vector<4x16x16xf32> to vector<4x256xf32>
    %c0_57 = arith.constant 0 : index
    %c0_58 = arith.constant 0 : index
    %c1_59 = arith.constant 1 : index
    %101 = vector.load %arg9[%c0_57, %c0_58, %c1_59] : memref<4x18x18xf32, #tpu.memory_space<vmem>>, vector<4x16x16xf32>
    %102 = vector.shape_cast %101 : vector<4x16x16xf32> to vector<4x256xf32>
    %c0_60 = arith.constant 0 : index
    %c0_61 = arith.constant 0 : index
    %c2_62 = arith.constant 2 : index
    %103 = vector.load %arg9[%c0_60, %c0_61, %c2_62] : memref<4x18x18xf32, #tpu.memory_space<vmem>>, vector<4x16x16xf32>
    %104 = vector.shape_cast %103 : vector<4x16x16xf32> to vector<4x256xf32>
    %c0_63 = arith.constant 0 : index
    %c1_64 = arith.constant 1 : index
    %c0_65 = arith.constant 0 : index
    %105 = vector.load %arg9[%c0_63, %c1_64, %c0_65] : memref<4x18x18xf32, #tpu.memory_space<vmem>>, vector<4x16x16xf32>
    %106 = vector.shape_cast %105 : vector<4x16x16xf32> to vector<4x256xf32>
    %c0_66 = arith.constant 0 : index
    %c1_67 = arith.constant 1 : index
    %c1_68 = arith.constant 1 : index
    %107 = vector.load %arg9[%c0_66, %c1_67, %c1_68] : memref<4x18x18xf32, #tpu.memory_space<vmem>>, vector<4x16x16xf32>
    %108 = vector.shape_cast %107 : vector<4x16x16xf32> to vector<4x256xf32>
    %c0_69 = arith.constant 0 : index
    %c1_70 = arith.constant 1 : index
    %c2_71 = arith.constant 2 : index
    %109 = vector.load %arg9[%c0_69, %c1_70, %c2_71] : memref<4x18x18xf32, #tpu.memory_space<vmem>>, vector<4x16x16xf32>
    %110 = vector.shape_cast %109 : vector<4x16x16xf32> to vector<4x256xf32>
    %c0_72 = arith.constant 0 : index
    %c2_73 = arith.constant 2 : index
    %c0_74 = arith.constant 0 : index
    %111 = vector.load %arg9[%c0_72, %c2_73, %c0_74] : memref<4x18x18xf32, #tpu.memory_space<vmem>>, vector<4x16x16xf32>
    %112 = vector.shape_cast %111 : vector<4x16x16xf32> to vector<4x256xf32>
    %c0_75 = arith.constant 0 : index
    %c2_76 = arith.constant 2 : index
    %c1_77 = arith.constant 1 : index
    %113 = vector.load %arg9[%c0_75, %c2_76, %c1_77] : memref<4x18x18xf32, #tpu.memory_space<vmem>>, vector<4x16x16xf32>
    %114 = vector.shape_cast %113 : vector<4x16x16xf32> to vector<4x256xf32>
    %c0_78 = arith.constant 0 : index
    %c2_79 = arith.constant 2 : index
    %c2_80 = arith.constant 2 : index
    %115 = vector.load %arg9[%c0_78, %c2_79, %c2_80] : memref<4x18x18xf32, #tpu.memory_space<vmem>>, vector<4x16x16xf32>
    %116 = vector.shape_cast %115 : vector<4x16x16xf32> to vector<4x256xf32>
    %117 = tpu.concatenate %100, %102, %104, %106, %108, %110, %112, %114, %116 in 0 : vector<4x256xf32>, vector<4x256xf32>, vector<4x256xf32>, vector<4x256xf32>, vector<4x256xf32>, vector<4x256xf32>, vector<4x256xf32>, vector<4x256xf32>, vector<4x256xf32> -> vector<36x256xf32>
    %c0_81 = arith.constant 0 : index
    %c0_82 = arith.constant 0 : index
    %118 = vector.load %arg6[%c0_81, %c0_82] : memref<4x36xf32, #tpu.memory_space<vmem>>, vector<4x36xf32>
    %cst_83 = arith.constant dense<0.000000e+00> : vector<4x256xf32>
    %119 = tpu.matmul %118, %117, %cst_83 {dimension_numbers = #tpu.dot_dimension_numbers<[1], [0], [0], [1], [0, 0, 1, 1], [], []>} : vector<4x36xf32>, vector<36x256xf32>, vector<4x256xf32> -> vector<4x256xf32>
    %c0_84 = arith.constant 0 : index
    %c0_85 = arith.constant 0 : index
    %120 = vector.load %arg7[%c0_84, %c0_85] : memref<4x1xf32, #tpu.memory_space<vmem>>, vector<4x1xf32>
    %121 = vector.broadcast %120 : vector<4x1xf32> to vector<4x256xf32>
    %122 = arith.addf %119, %121 : vector<4x256xf32>
    %c0_86 = arith.constant 0 : index
    %c0_87 = arith.constant 0 : index
    %c0_88 = arith.constant 0 : index
    %123 = vector.load %arg8[%c0_86, %c0_87, %c0_88] : memref<1x4x256xf32, #tpu.memory_space<vmem>>, vector<1x4x256xf32>
    %124 = vector.shape_cast %123 : vector<1x4x256xf32> to vector<4x256xf32>
    %125 = vector.shape_cast %122 : vector<4x256xf32> to vector<1x4x256xf32>
    tpu.vector_store %arg8[%c0_86, %c0_87, %c0_88], %125 {strides = array<i32>} : memref<1x4x256xf32, #tpu.memory_space<vmem>>, vector<1x4x256xf32>,
    return
  }
  func.func @transform_0(%arg0: i32) -> (i32, i32, i32) {
    %c0_i32 = arith.constant 0 : i32
    %c0_i32_0 = arith.constant 0 : i32
    %c0_i32_1 = arith.constant 0 : i32
    return %arg0, %c0_i32, %c0_i32_0 : i32, i32, i32
  }
  func.func @transform_1(%arg0: i32) -> (i32, i32, i32) {
    %c0_i32 = arith.constant 0 : i32
    %c0_i32_0 = arith.constant 0 : i32
    %c0_i32_1 = arith.constant 0 : i32
    return %arg0, %c0_i32, %c0_i32_0 : i32, i32, i32
  }
  func.func @transform_2(%arg0: i32) -> (i32, i32, i32) {
    %c0_i32 = arith.constant 0 : i32
    %c0_i32_0 = arith.constant 0 : i32
    %c0_i32_1 = arith.constant 0 : i32
    return %arg0, %c0_i32, %c0_i32_0 : i32, i32, i32
  }
  func.func @transform_3(%arg0: i32) -> (i32, i32, i32) {
    %c0_i32 = arith.constant 0 : i32
    %c0_i32_0 = arith.constant 0 : i32
    %c0_i32_1 = arith.constant 0 : i32
    return %arg0, %c0_i32, %c0_i32_0 : i32, i32, i32
  }
  func.func @transform_4(%arg0: i32) -> (i32, i32) {
    %c0_i32 = arith.constant 0 : i32
    %c0_i32_0 = arith.constant 0 : i32
    %c0_i32_1 = arith.constant 0 : i32
    return %c0_i32, %c0_i32_0 : i32, i32
  }
  func.func @transform_5(%arg0: i32) -> (i32, i32) {
    %c0_i32 = arith.constant 0 : i32
    %c0_i32_0 = arith.constant 0 : i32
    %c0_i32_1 = arith.constant 0 : i32
    return %c0_i32, %c0_i32_0 : i32, i32
  }
  func.func @transform_6(%arg0: i32) -> (i32, i32) {
    %c0_i32 = arith.constant 0 : i32
    %c0_i32_0 = arith.constant 0 : i32
    %c0_i32_1 = arith.constant 0 : i32
    return %c0_i32, %c0_i32_0 : i32, i32
  }
  func.func @transform_7(%arg0: i32) -> (i32, i32, i32) {
    %c0_i32 = arith.constant 0 : i32
    %c0_i32_0 = arith.constant 0 : i32
    %c0_i32_1 = arith.constant 0 : i32
    return %arg0, %c0_i32, %c0_i32_0 : i32, i32, i32
  }
}

</mosaic_0001>

<bundles_post_ra>
// kernel: tpu_custom_call.1
= control target key start
LH: loop header
LB: loop body
LE: loop exit
PB: predicated region body
PF: predicated region fallthrough
CT: control target
= control target key end

     0   :  { %s5919_s0 = inlined_call_operand.hbm [shape: f32[2,4,256], index: 0, kind: input, shape index: {}]   ;;  %s5920_s1 = inlined_call_operand.hbm [shape: f32[2,4,256], index: 1, kind: input, shape index: {}]   ;;  %s5921_s2 = inlined_call_operand.vmem [shape: f32[2,4,64], index: 2, kind: input, shape index: {}]   ;;  %s5922_s3 = inlined_call_operand.vmem [shape: f32[2,4,64], index: 3, kind: input, shape index: {}]   ;;  %s5923_s4 = inlined_call_operand.hbm [shape: f32[64,256], index: 4, kind: input, shape index: {}]   ;;  %s5924_s5 = inlined_call_operand.vmem [shape: f32[4,36], index: 5, kind: input, shape index: {}]   ;;  %s5925_s6 = inlined_call_operand.vmem [shape: f32[4,1], index: 6, kind: input, shape index: {}]   ;;  %s5926_s7 = inlined_call_operand.hbm [shape: f32[2,4,256], index: 7, kind: output, shape index: {}]  }
   0x1   :  { %5981 = sst [smem:[#allocation61_spill]] %s5923_s4 }
   0x2   :  { %12 = vsyncpa [#allocation4], 0 }
   0x3   :  { %14 = vsyncpa [#allocation4 + $0x1], 0 }
   0x4   :  { %15 = vsyncpa [#allocation7], 0 }
   0x5   :  { %17 = vsyncpa [#allocation7 + $0x1], 0 }
   0x6   :  { %18 = vsyncpa [#allocation5], 0 }
   0x7   :  { %20 = vsyncpa [#allocation5 + $0x1], 0  ;;  %s4060_s24 = smov 0   ;;  %s4062_s25 = smov 0  }
   0x8   :  { %s4064_s26 = smov 0   ;;  %s4066_s27 = smov 0  }
   0x9 LB: > { %5982 = sst [smem:[#allocation14_spill]] %s3992_s26  ;;  %s4081_s28 = sadd.s32 4294967295, %s3996_s27   ;;  %s3996_s27 = sphi %s4066_s27, %s6137_s27   ;;  %s3992_s26 = sphi %s4064_s26, %s6139_s26   ;;  %s3988_s25 = sphi %s4062_s25, %s6141_s25   ;;  %s3984_s24 = sphi %s4060_s24, %s6140_s24  }
   0xa   : > { %s3383_s29 = sadd.s32 4294967294, %s3996_s27   ;;  %p46_p0 = scmp.ne.s32.totalorder %s3988_s25, %s3984_s24 }
   0xb   : > { %p5927_p1 = scmp.eq.s32.totalorder %s4081_s28, 0  ;;  %p217_p3 = scmp.eq.s32.totalorder %s3383_s29, 1 }
   0xc   : > { %p3384_p5 = scmp.ge.s32.totalorder %s3996_s27, 1  ;;  %p224_p7 = scmp.lt.s32.totalorder %s3996_s27, 3 }
   0xd   : > { %p4090_p4 = por %p5927_p1, %p46_p0  ;;  %p4095_p6 = por %p217_p3, %p46_p0 }
   0xe   : > { %p4100_p8 = pnand %p3384_p5, %p224_p7  ;;  %s3998_s10 = smov [#allocation8]  }
   0xf   : > { %s5983_s30 = scalar_select %p4090_p4, 1, 0 }
  0x10   : > { %s5984_s8 = scalar_select %p4095_p6, 1, 0 }
  0x11   : > { %s5985_s9 = scalar_select %p4100_p8, 1, 0 }
  0x12   : > { %s236_s11 = sshll.u32 %s3998_s10, 4  ;;  %p3450_p9 = pneg %p4100_p8  ;;  %s4104_s11 = int_to_ptr.vmem [resolvable:$true] %s236_s11 }
  0x13   : > { %s4116_s13 = sadd.s32 1, %s3996_s27   ;;  %s33_s14 = sadd.s32 1, %s3992_s26 }
  0x14   : > { %p4111_p11 = pnand %p3450_p9, %p5927_p1  ;;  %5987 = sst [smem:[#allocation15_spill]] %s4116_s13 }
  0x15   : > { %s30_s15 = ssub.s32 %s3996_s27, %s4116_s13  ;;  %s5988_s4 = sld [smem:[#allocation61_spill]] }
  0x16   : > { %p3836_p13 = pneg %p4111_p11 }
  0x1b   : > { %s3834_s18 = scalar_lea.hbm %s5988_s4, 2048 }
  0x1c   : > { %p3835_p12 = scmp.ne.s32.totalorder %s5988_s4, %s3834_s18  ;;  %p3841_p5 = scmp.lt.u32.totalorder %s3834_s18, %s5988_s4 }
  0x1e   : > { %p3837_p0 = pnand %p3836_p13, %p3835_p12 }
  0x20   : > { %p3838_p3 = pneg %p3837_p0 }
  0x22   : > { %p3843_p7 = pnand %p3841_p5, %p3838_p3 }
  0x24   : > { %3846 = shalt.err (!%p3843_p7)
}
  0x25   : > { %s3847_s23 = scalar_lea.vmem %s4104_s11, 2048  ;;  %p3855_p2 = scmp.lt.s32.totalorder %s4104_s11, %s4104_s11 }
  0x26   : > { %p3848_p9 = scmp.ne.s32.totalorder %s4104_s11, %s3847_s23  ;;  %p3856_p6 = scmp.lt.s32.totalorder %s3847_s23, %s3847_s23 }
  0x28   : > { %p3850_p10 = pnand %p3848_p9, %p3836_p13  ;;  %p3857_p4 = por %p3856_p6, %p3855_p2 }
  0x2a   : > { %p3851_p1 = pneg %p3850_p10 }
  0x2c   : > { %p3858_p8 = pnand %p3857_p4, %p3851_p1 }
  0x2e   : > { %3861 = shalt.err (!%p3858_p8)
}
  0x2f   : > { %s3999_s29 = smov 256   ;;  %s4000_s10 = smov 16  }
  0x30   : > { %3453 = dma.hbm_to_vmem [thread:$0]  (!%p4111_p11), %s5988_s4, 2048, %s4104_s11, [#allocation7], %s3999_s29, %s3999_s29, %s4000_s10  }
  0x31   : > { %p31_p2 = scmp.eq.s32.totalorder %s30_s15, 0  ;;  %p40_p1 = scmp.ne.s32.totalorder %s3992_s26, %s3988_s25 }
  0x32   : > { %p41_p4 = scmp.eq.s32.totalorder %s3996_s27, 0  ;;  %p3466_p6 = scmp.lt.s32.totalorder %s3996_s27, 2 }
  0x33   : > { %s4147_s18 = scalar_select %p31_p2, %s3992_s26, %s33_s14  }
  0x34   : > { %p42_p8 = por %p41_p4, %p40_p1  ;;  %p5990_p10 = scmp.eq.s32.totalorder %s4081_s28, 1 }
  0x35   : > { %5989 = sst [smem:[#allocation16_spill]] %s4147_s18  ;;  %s256_s20 = sand.u32 1, %s3992_s26  }
  0x36   : > { %p4151_p12 = por %p5990_p10, %p40_p1  ;;  %s3413_s21 = sshll.u32 %s3996_s27, 7 }
  0x37   : > { %s4157_s22 = sshll.u32 %s256_s20, 3  ;;  %s4162_s11 = scalar_lea.hbm %s5919_s0, %s3413_s21 }
  0x38   : > { %s5991_s19 = scalar_select %p4151_p12, 1, 0 }
  0x39   : > { %s260_s14 = scalar_lea.vmem [#allocation3], %s4157_s22  ;;  %p4165_p11 = pnand %p3466_p6, %p42_p8 }
  0x3a   : > { %s268_s15 = sshll.u32 %s260_s14, 4  ;;  %s4174_s17 = scalar_lea.hbm %s5920_s1, %s3413_s21  ;;  %s4169_s15 = int_to_ptr.vmem [resolvable:$true] %s268_s15 }
  0x3b   : > { %s257_s12 = scalar_lea.sflag [#allocation4], %s256_s20  ;;  %s3862_s23 = scalar_lea.hbm %s4162_s11, 128 }
  0x3c   : > { %p3863_p13 = scmp.ne.s32.totalorder %s4162_s11, %s3862_s23  ;;  %p3864_p0 = pneg %p4165_p11 }
  0x3d   : > { %s3867_s18 = scalar_lea.hbm %s5919_s0, 256  ;;  %p3868_p7 = scmp.lt.u32.totalorder %s4162_s11, %s5919_s0 }
  0x3e   : > { %p3865_p3 = pnand %p3864_p0, %p3863_p13  ;;  %p3869_p9 = scmp.lt.u32.totalorder %s3867_s18, %s3862_s23 }
  0x3f   : > { %p3871_p1 = scmp.lt.u32.totalorder %s3862_s23, %s4162_s11 }
  0x40   : > { %p3866_p5 = pneg %p3865_p3  ;;  %p3870_p2 = por %p3869_p9, %p3868_p7 }
  0x42   : > { %p3872_p4 = por %p3871_p1, %p3870_p2 }
  0x44   : > { %p3873_p6 = pnand %p3872_p4, %p3866_p5 }
  0x46   : > { %3876 = shalt.err (!%p3873_p6)
}
  0x47   : > { %s3877_s20 = scalar_lea.vmem %s4169_s15, 128  ;;  %s4001_s4 = smov [#allocation3]  }
  0x48   : > { %p3878_p8 = scmp.ne.s32.totalorder %s4169_s15, %s3877_s20  ;;  %s3882_s21 = sshll.u32 %s4001_s4, 4  ;;  %s3883_s21 = int_to_ptr.vmem [resolvable:$false] %s3882_s21 }
  0x49   : > { %s3884_s26 = scalar_lea.vmem %s3883_s21, 256  ;;  %p3885_p3 = scmp.lt.s32.totalorder %s4169_s15, %s3883_s21 }
  0x4a   : > { %p3880_p10 = pnand %p3878_p8, %p3864_p0  ;;  %p3886_p7 = scmp.lt.s32.totalorder %s3884_s26, %s3877_s20 }
  0x4c   : > { %p3881_p13 = pneg %p3880_p10  ;;  %p3887_p9 = por %p3886_p7, %p3885_p3 }
  0x4e   : > { %p3888_p2 = pnand %p3887_p9, %p3881_p13 }
  0x50   : > { %3891 = shalt.err (!%p3888_p2)
}
  0x51   : > { %3457 = dma.hbm_to_vmem [thread:$0]  (!%p4165_p11), %s4162_s11, 128, %s4169_s15, %s257_s12  }
  0x52   : > { %s275_s13 = sand.u32 1, %s3996_s27   ;;  %s279_s18 = scalar_lea.vmem [#allocation6], %s4157_s22 }
  0x53   : > { %s287_s10 = sshll.u32 %s279_s18, 4  ;;  %s276_s16 = scalar_lea.sflag [#allocation7], %s275_s13  ;;  %s288_s10 = int_to_ptr.vmem [resolvable:$true] %s287_s10 }
  0x54   : > { %s3892_s23 = scalar_lea.hbm %s4174_s17, 128  ;;  %s3897_s4 = scalar_lea.hbm %s5920_s1, 256 }
  0x55   : > { %p3893_p5 = scmp.ne.s32.totalorder %s4174_s17, %s3892_s23  ;;  %p3898_p6 = scmp.lt.u32.totalorder %s4174_s17, %s5920_s1 }
  0x56   : > { %p3899_p8 = scmp.lt.u32.totalorder %s3897_s4, %s3892_s23  ;;  %p3901_p13 = scmp.lt.u32.totalorder %s3892_s23, %s4174_s17 }
  0x57   : > { %p3895_p1 = pnand %p3893_p5, %p3864_p0 }
  0x58   : > { %p3900_p10 = por %p3899_p8, %p3898_p6 }
  0x59   : > { %p3896_p4 = pneg %p3895_p1 }
  0x5a   : > { %p3902_p3 = por %p3901_p13, %p3900_p10 }
  0x5c   : > { %p3903_p7 = pnand %p3902_p3, %p3896_p4 }
  0x5e   : > { %3906 = shalt.err (!%p3903_p7)
}
  0x5f   : > { %s3907_s22 = scalar_lea.vmem %s288_s10, 128  ;;  %s4002_s11 = smov [#allocation6]  }
  0x60   : > { %p3908_p9 = scmp.ne.s32.totalorder %s288_s10, %s3907_s22  ;;  %s3912_s15 = sshll.u32 %s4002_s11, 4  ;;  %s3913_s15 = int_to_ptr.vmem [resolvable:$false] %s3912_s15 }
  0x61   : > { %s3914_s12 = scalar_lea.vmem %s3913_s15, 256  ;;  %p3915_p1 = scmp.lt.s32.totalorder %s288_s10, %s3913_s15 }
  0x62   : > { %p3910_p2 = pnand %p3908_p9, %p3864_p0  ;;  %p3916_p12 = scmp.lt.s32.totalorder %s3914_s12, %s3907_s22 }
  0x64   : > { %p3911_p5 = pneg %p3910_p2  ;;  %p3917_p6 = por %p3916_p12, %p3915_p1 }
  0x66   : > { %p3918_p8 = pnand %p3917_p6, %p3911_p5 }
  0x68   : > { %3921 = shalt.err (!%p3918_p8)
}
  0x69   : > { %3460 = dma.hbm_to_vmem [thread:$0]  (!%p4165_p11), %s4174_s17, 128, %s288_s10, %s276_s16  }
  0x6a   : > { %p5993_p4 = scmp.ne.s32.totalorder %s5985_s9, 0 }
  0x6c   : > { %310 = sbr.rel (%p5993_p4) target bundleno = 1722 (0x6ba), region = 48 }
  0x73   : > { %s4225_s13 = sand.u32 1, %s3988_s25   ;;  %p5994_p12 = scmp.ne.s32.totalorder %s5983_s30, 0 }
  0x74   : > { %s4228_s18 = sshll.u32 %s4225_s13, 3  ;;  %s313_s23 = scalar_lea.sflag [#allocation4], %s4225_s13 }
  0x75   : > { %s316_s14 = scalar_lea.vmem [#allocation3], %s4228_s18 }
  0x76   : > { %3967 = dma.done.wait (%p5994_p12), %s313_s23, 128  }
  0x77   : > { %3969 = vsyncadd (%p5994_p12), %s313_s23, 4294967168  ;;  %s321_s9 = sand.u32 1, %s4081_s28   ;;  %s325_s17 = scalar_lea.vmem [#allocation6], %s4228_s18 }
  0x78   : > { %s322_s29 = scalar_lea.sflag [#allocation7], %s321_s9 }
  0x79   : > { %3971 = dma.done.wait (%p5994_p12), %s322_s29, 128  }
  0x7a   : > { %3973 = vsyncadd (%p5994_p12), %s322_s29, 4294967168  ;;  %p5995_p11 = scmp.eq.s32.totalorder %s4081_s28, 0 }
  0x7c   : > { %3975 = dma.done.wait (%p5995_p11), [#allocation7], 2048   ;;  %p5996_p0 = pmov %p5995_p11 }
  0x7d   : > { %p373_p10 = scmp.lt.s32.totalorder %s4081_s28, 1  ;;  %vm478_vm0 = vcmask 519168   ;;  %v525_v8 = vld [vmem:[#allocation8 + $0x8] sm:$0xff]  ;;  %v527_v9 = vld [vmem:[#allocation8 + $0x18] sm:$0xff]  ;;  %v524_v10 = vld [vmem:[#allocation8] sm:$0xff]  ;;  %vm386_vm1 = vcmask 1043456  }
  0x7e   : > { %3977 = vsyncadd (%p5996_p0), [#allocation7], 4294965248  ;;  %v3416_v11 = vpack.c.bf16 %v527_v9, %v525_v8  ;;  %v526_v12 = vld [vmem:[#allocation8 + $0x10] sm:$0xff]  ;;  %v529_v13 = vld [vmem:[#allocation8 + $0x28] sm:$0xff]  ;;  %v5934_v15 = vmov 0.0   ;;  %vm540_vm6 = vcmask 523264  }
  0x7f   : > { %s374_s10 = scalar_select %p373_p10, %s4081_s28, 1  ;;  %v531_v14 = vld [vmem:[#allocation8 + $0x38] sm:$0xff]  ;;  %608 = vmatprep.mubr.f32.mxu0 %v5934_v15  ;;  %3230 = vmatprep.mubr.f32.mxu1 %v5934_v15  ;;  %v3418_v16 = vpack.c.bf16 %v526_v12, %v524_v10  ;;  %v528_v18 = vld [vmem:[#allocation8 + $0x20] sm:$0xff]  ;;  %v530_v19 = vld [vmem:[#allocation8 + $0x30] sm:$0xff]  ;;  %vm842_vm11 = vcmask 138248   ;;  %vm879_vm12 = vcmask 132105  }
  0x80   : > { %v3420_v17 = vpack.c.bf16 %v531_v14, %v529_v13  ;;  %v4263_v20 = vld [vmem:[%s316_s14] sm:$0xff]  ;;  %3417 = vmatprep.subr.bf16.mxu0 %v3416_v11  ;;  %v535_v24 = vld [vmem:[#allocation8 + $0x58] sm:$0xff]  ;;  %v3422_v26 = vpack.c.bf16 %v530_v19, %v528_v18  ;;  %v534_v30 = vld [vmem:[#allocation8 + $0x50] sm:$0xff]  ;;  %s4005_s11 = smov 96   ;;  %s4006_s15 = smov 112   ;;  %vm912_vm13 = vcmask 133130  }
  0x81   : > { %s3398_s16 = sshll.u32 %s374_s10, 2  ;;  %v384_v21 = vcombine.high %v4263_v20, %v4263_v20  ;;  %v387_v22 = vsel %vm386_vm1, %v4263_v20, 0.0  ;;  %v533_v23 = vld [vmem:[#allocation8 + $0x48] sm:$0xff]  ;;  %v392_v25 = vmul.f32 %v4263_v20, %v4263_v20  ;;  %3419 = vmatpush1.bf16.msra.mxu0 %v3418_v16  ;;  %v532_v29 = vld [vmem:[#allocation8 + $0x40] sm:$0xff]  ;;  %v539_v34 = vld [vmem:[#allocation8 + $0x78] sm:$0xff]  ;;  %s4007_s12 = smov 80  }
  0x82   : > { %s380_s21 = scalar_lea.vmem %s5922_s3, %s3398_s16  ;;  %s376_s30 = scalar_lea.vmem %s5921_s2, %s3398_s16  ;;  %3421 = vmatprep.subr.bf16.mxu0 %v3420_v17  ;;  %v3424_v28 = vpack.c.bf16 %v535_v24, %v533_v23  ;;  %v537_v33 = vld [vmem:[#allocation8 + $0x68] sm:$0xff]  ;;  %v3426_v37 = vpack.c.bf16 %v534_v30, %v532_v29  ;;  %v536_v40 = vld [vmem:[#allocation8 + $0x60] sm:$0xff]  ;;  %v538_v41 = vld [vmem:[#allocation8 + $0x70] sm:$0xff]  ;;  %vm977_vm14 = vcmask 7168   ;;  %vm980_vm15 = vcmask 1024  }
  0x83   : > { %v477_v0 = vld [vmem:[%s380_s21] sm:$0xf]  ;;  %v388_v27 = vsel %vm386_vm1, %v384_v21, 0.0  ;;  %v394_v31 = vcombine.high %v392_v25, %v392_v25  ;;  %v396_v35 = vsel %vm386_vm1, %v392_v25, 0.0  ;;  %v3428_v39 = vpack.c.bf16 %v539_v34, %v537_v33  ;;  %v382_v43 = vld [vmem:[%s325_s17] sm:$0xff]  ;;  %s4008_s23 = smov 48  }
  0x84   : > { %v4254_v1 = vld [vmem:[%s376_s30] sm:$0xf]  ;;  %v499_v2 = vsel %vm478_vm0, %v477_v0, 0.0  ;;  %v502_v3 = vmul.f32 %v477_v0, %v477_v0  ;;  %v389_v32 = vadd.f32 %v388_v27, %v387_v22  ;;  %v3430_v42 = vpack.c.bf16 %v538_v41, %v536_v40  ;;  %s4009_s14 = smov 64   ;;  %s4010_s9 = smov 16  }
  0x85   : > { %v479_v4 = vsel %vm478_vm0, %v4254_v1, 0.0  ;;  %v482_v5 = vmul.f32 %v4254_v1, %v4254_v1  ;;  %500 = vadd.xlane.f32.xlu1 %v499_v2  ;;  %v397_v36 = vsel %vm386_vm1, %v394_v31, 0.0  ;;  %3423 = vmatpush1.bf16.msra.mxu0 %v3422_v26  ;;  %v415_v44 = vcombine.high %v382_v43, %v382_v43  ;;  %s4011_s29 = smov 32   ;;  %s4014_s17 = smov 1  }
  0x86   : > { %480 = vadd.xlane.f32.xlu0 %v479_v4  ;;  %v503_v6 = vsel %vm478_vm0, %v502_v3, 0.0  ;;  %v398_v38 = vadd.f32 %v397_v36, %v396_v35  ;;  %3425 = vmatprep.subr.bf16.mxu0 %v3424_v28  ;;  %v417_v45 = vsel %vm386_vm1, %v382_v43, 0.0  ;;  %v422_v48 = vmul.f32 %v382_v43, %v382_v43  ;;  %s4015_s10 = smov 126   ;;  %s4016_s16 = smov 2  }
  0x87   : > { %v483_v7 = vsel %vm478_vm0, %v482_v5, 0.0  ;;  %v418_v46 = vsel %vm386_vm1, %v415_v44, 0.0  ;;  %v4004_v44 = vmov 839922192   ;;  %vm1051_vm0 = vcmask 146568   ;;  %s4017_s20 = smov 127  }
  0x88   : > { %v419_v47 = vadd.f32 %v418_v46, %v417_v45  ;;  %v424_v49 = vcombine.high %v422_v48, %v422_v48  ;;  %v426_v50 = vsel %vm386_vm1, %v422_v48, 0.0  ;;  %v446_v45 = vunpack.c.l.s4 %v4004_v44  ;;  %s3415_s30 = sshll.u32 %s4081_s28, 7  ;;  %p6134_p3 = scmp.ne.s32.totalorder %s5991_s19, 0 }
  0x89   : > { %504 = vadd.xlane.f32.xlu1 %v503_v6  ;;  %3427 = vmatpush1.bf16.msra.mxu0 %v3426_v37  ;;  %v448_v46 = vlaneseq  ;;  %s4019_s28 = smov [#allocation9]  }
  0x8a   : > { %484 = vadd.xlane.f32.xlu0 %v483_v7  ;;  %3429 = vmatprep.subr.bf16.mxu0 %v3428_v39  ;;  %v427_v51 = vsel %vm386_vm1, %v424_v49, 0.0  ;;  %v447_v48 = vunpack.c.0.s8 %v446_v45 }
  0x8b   : > { %v428_v52 = vadd.f32 %v427_v51, %v426_v50  ;;  %v4282_v49 = vshrl.u32 %v448_v46, 7 }
  0x8d   : > { %399 = vadd.xlane.f32.xlu1 %v398_v38  ;;  %3431 = vmatpush1.bf16.msra.mxu0 %v3430_v42 }
  0x8e   : > { %390 = vadd.xlane.f32.xlu0 %v389_v32 }
  0x91   : > { %429 = vadd.xlane.f32.xlu1 %v428_v52  ;;  %v450_v52 = vsub.s32 %v447_v48, %v4282_v49 }
  0x92   : > { %420 = vadd.xlane.f32.xlu0 %v419_v47 }
 0x112   : > { %v501_v53 = vpop.xlane.xlu1 %500 }
 0x113   : > { %v481_v54 = vpop.xlane.xlu0 %480  ;;  %v506_v55 = vmul.f32 0.015625, %v501_v53 }
 0x114   : > { %v486_v56 = vmul.f32 0.015625, %v481_v54 }
 0x115   : > { %v507_v57 = vmul.f32 64.0, %v506_v55 }
 0x116   : > { %v487_v58 = vmul.f32 64.0, %v486_v56  ;;  %v505_v59 = vpop.xlane.xlu1 %504  ;;  %v519_v18 = vsub.f32 %v4254_v1, %v486_v56 }
 0x117   : > { %v485_v60 = vpop.xlane.xlu0 %484  ;;  %v508_v61 = vmul.f32 %v507_v57, %v506_v55 }
 0x118   : > { %v488_v62 = vmul.f32 %v487_v58, %v486_v56 }
 0x119   : > { %v509_v63 = vsub.f32 %v505_v59, %v508_v61 }
 0x11a   : > { %v489_v0 = vsub.f32 %v485_v60, %v488_v62  ;;  %v400_v27 = vpop.xlane.xlu1 %399 }
 0x11b   : > { %v510_v3 = vmul.f32 0.015873017, %v509_v63  ;;  %v391_v23 = vpop.xlane.xlu0 %390 }
 0x11c   : > { %v490_v2 = vmul.f32 0.015873017, %v489_v0  ;;  %v401_v24 = vmul.f32 0.00390625, %v391_v23 }
 0x11d   : > { %v511_v5 = vadd.f32 1e-05, %v510_v3 }
 0x11e   : > { %v491_v4 = vadd.f32 1e-05, %v490_v2  ;;  %v402_v25 = vmul.f32 256.0, %v401_v24  ;;  %v430_v35 = vpop.xlane.xlu1 %429 }
 0x11f   : > { %vm514_vm4 = vcmp.eq.f32.partialorder %v511_v5, inf  ;;  %v517_v14 = vand.u32 2147483648, %v511_v5  ;;  %vm516_vm5 = vcmp.eq.f32.partialorder %v511_v5, 0.0  ;;  %v421_v28 = vpop.xlane.xlu0 %420 }
 0x120   : > { %3822 = vrsqrt.f32 %v491_v4  ;;  %vm494_vm2 = vcmp.eq.f32.partialorder %v491_v4, inf  ;;  %v497_v8 = vand.u32 2147483648, %v491_v4  ;;  %vm496_vm3 = vcmp.eq.f32.partialorder %v491_v4, 0.0 }
 0x121   : > { %3824 = vrsqrt.f32 %v511_v5  ;;  %v403_v26 = vmul.f32 %v402_v25, %v401_v24  ;;  %v431_v30 = vmul.f32 0.00390625, %v421_v28 }
 0x123   : > { %v404_v29 = vsub.f32 %v400_v27, %v403_v26  ;;  %v432_v32 = vmul.f32 256.0, %v431_v30  ;;  %v473_v59 = vrot.slane %v431_v30, %v450_v52 }
 0x125   : > { %v405_v31 = vmul.f32 0.003921569, %v404_v29  ;;  %v433_v34 = vmul.f32 %v432_v32, %v431_v30 }
 0x127   : > { %v406_v33 = vadd.f32 1e-05, %v405_v31  ;;  %v434_v1 = vsub.f32 %v430_v35, %v433_v34 }
 0x129   : > { %v435_v36 = vmul.f32 0.003921569, %v434_v1  ;;  %vm409_vm7 = vcmp.eq.f32.partialorder %v406_v33, inf  ;;  %v412_v40 = vand.u32 2147483648, %v406_v33  ;;  %vm411_vm8 = vcmp.eq.f32.partialorder %v406_v33, 0.0 }
 0x12a   : > { %v3823_v6 = vpop.eup %3822 }
 0x12b   : > { %v493_v7 = vmul.f32 %v3823_v6, %v491_v4  ;;  %v3825_v11 = vpop.eup %3824  ;;  %v436_v37 = vadd.f32 1e-05, %v435_v36 }
 0x12c   : > { %v513_v12 = vmul.f32 %v3825_v11, %v511_v5 }
 0x12d   : > { %v495_v9 = vsel %vm494_vm2, %v491_v4, %v493_v7  ;;  %vm439_vm9 = vcmp.eq.f32.partialorder %v436_v37, inf  ;;  %v442_v50 = vand.u32 2147483648, %v436_v37  ;;  %vm441_vm10 = vcmp.eq.f32.partialorder %v436_v37, 0.0 }
 0x12e   : > { %v498_v10 = vsel %vm496_vm3, %v497_v8, %v495_v9  ;;  %v515_v13 = vsel %vm514_vm4, %v511_v5, %v513_v12  ;;  %vm1054_vm2 = vcmask 140424   ;;  %vm1265_vm3 = vcmask 130048  }
 0x12f   : > { %3826 = vrcp.f32 %v498_v10  ;;  %v518_v17 = vsel %vm516_vm5, %v517_v14, %v515_v13  ;;  %v4013_v10 = vmov 1934713408   ;;  %vm1267_vm4 = vcmask 261120  }
 0x130   : > { %3828 = vrsqrt.f32 %v406_v33  ;;  %v677_v11 = vunpack.c.l.s4 %v4013_v10  ;;  %vm1269_vm5 = vcmask 392192  }
 0x131   : > { %3830 = vrsqrt.f32 %v436_v37 }
 0x132   : > { %v678_v23 = vunpack.c.0.s8 %v677_v11 }
 0x134   : > { %v4300_v1 = vsub.s32 %v678_v23, %v4282_v49 }
 0x139   : > { %v3827_v16 = vpop.eup %3826 }
 0x13a   : > { %v521_v19 = vmul.f32 %v3827_v16, %v518_v17  ;;  %v3829_v38 = vpop.eup %3828 }
 0x13b   : > { %v408_v39 = vmul.f32 %v3829_v38, %v406_v33  ;;  %v3831_v43 = vpop.eup %3830 }
 0x13c   : > { %v522_v21 = vmul.f32 %v521_v19, %v519_v18  ;;  %v438_v47 = vmul.f32 %v3831_v43, %v436_v37 }
 0x13d   : > { %v410_v41 = vsel %vm409_vm7, %v406_v33, %v408_v39  ;;  %vm1272_vm7 = vcmask 654336  }
 0x13e   : > { %v523_v22 = vadd.f32 %v522_v21, %v506_v55  ;;  %v413_v42 = vsel %vm411_vm8, %v412_v40, %v410_v41  ;;  %v440_v51 = vsel %vm439_vm9, %v436_v37, %v438_v47  ;;  %v451_v55 = vrot.slane %v401_v24, %v450_v52 }
 0x13f   : > { %3832 = vrcp.f32 %v413_v42  ;;  %v443_v54 = vsel %vm441_vm10, %v442_v50, %v440_v51  ;;  %vm1274_vm8 = vcmask 785408   ;;  %vm1276_vm9 = vcmask 916480  }
 0x140   : > { %3400 = vmatmul.mubr.msk.f32.vlgmr.msra.gmra.mrb[0].mxu0 %vm540_vm6, %v523_v22  ;;  %v453_v57 = vsub.f32 %v4263_v20, %v451_v55  ;;  %v4012_v20 = vmov 1983009808  }
 0x141   : > { %v660_v3 = vunpack.c.l.s4 %v4012_v20  ;;  %v853_v20 = vsub.s32 1, %v4282_v49 }
 0x143   : > { %v661_v6 = vunpack.c.0.s8 %v660_v3 }
 0x145   : > { %v4294_v16 = vsub.s32 %v661_v6, %v4282_v49 }
 0x149   : > { %v3833_v53 = vpop.eup %3832 }
 0x14a   : > { %v455_v56 = vmul.f32 %v3833_v53, %v443_v54 }
 0x14c   : > { %v463_v58 = vrot.slane %v455_v56, %v450_v52 }
 0x14e   : > { %v465_v60 = vmul.f32 %v463_v58, %v453_v57 }
 0x150   : > { %v475_v63 = vadd.f32 %v473_v59, %v465_v60 }
 0x213   : > { %v610_v61 = vpop.f32.mrb[0].mxu0 }
 0x214   : > { %v612_v62 = vpop.f32.mrb[1].mxu0 }
 0x215   : > { %v617_v0 = vcombine.low %v610_v61, %v612_v62 }
 0x217   : > { %v619_v2 = vadd.f32 %v617_v0, %v475_v63 }
 0x219   : > { %627 = vrot.lane.b32.xlu1 %v619_v2, %s4005_s11  ;;  %623 = vrot.lane.b32.xlu0 %v619_v2, %s4006_s15  ;;  %v621_v17 = vrot.slane %v619_v2, 4 }
 0x21d   : > { %631 = vrot.lane.b32.xlu1 %v619_v2, %s4007_s12  ;;  %639 = vrot.lane.b32.xlu0 %v619_v2, %s4008_s23 }
 0x221   : > { %635 = vrot.lane.b32.xlu1 %v619_v2, %s4009_s14  ;;  %647 = vrot.lane.b32.xlu0 %v619_v2, %s4010_s9 }
 0x225   : > { %643 = vrot.lane.b32.xlu1 %v619_v2, %s4011_s29 }
 0x28b   : > { %v628_v4 = vpop.permute.xlu1 %627  ;;  %v624_v5 = vpop.permute.xlu0 %623 }
 0x28c   : > { %v629_v12 = vrot.slane %v628_v4, 4  ;;  %v625_v13 = vrot.slane %v624_v5, 4  ;;  %v658_v18 = vcombine.low %v619_v2, %v628_v4 }
 0x28e   : > { %v726_v24 = vcombine.low %v621_v17, %v629_v12  ;;  %v665_v29 = vrot.slane %v658_v18, %v4294_v16 }
 0x28f   : > { %v632_v7 = vpop.permute.xlu1 %631  ;;  %v640_v8 = vpop.permute.xlu0 %639 }
 0x290   : > { %v633_v9 = vrot.slane %v632_v7, 4  ;;  %v666_v14 = vcombine.low %v624_v5, %v632_v7  ;;  %v641_v27 = vrot.slane %v640_v8, 4  ;;  %v733_v36 = vrot.slane %v726_v24, %v4294_v16 }
 0x292   : > { %v734_v19 = vcombine.low %v625_v13, %v633_v9  ;;  %v673_v26 = vrot.slane %v666_v14, %v4294_v16  ;;  %v886_v9 = vsub.s32 2, %v4282_v49 }
 0x293   : > { %v636_v21 = vpop.permute.xlu1 %635  ;;  %v648_v22 = vpop.permute.xlu0 %647 }
 0x294   : > { %v649_v25 = vrot.slane %v648_v22, 4  ;;  %v700_v28 = vcombine.low %v640_v8, %v648_v22  ;;  %v741_v30 = vrot.slane %v734_v19, %v4294_v16  ;;  %v637_v32 = vrot.slane %v636_v21, 4 }
 0x295   : > { %v674_v37 = vcombine.low %v665_v29, %v673_v26  ;;  %v675_v53 = vcombine.high %v665_v29, %v673_v26 }
 0x296   : > { %v768_v33 = vcombine.low %v641_v27, %v649_v25  ;;  %v707_v38 = vrot.slane %v700_v28, %v4294_v16  ;;  %v742_v44 = vcombine.low %v733_v36, %v741_v30  ;;  %v743_v58 = vcombine.high %v733_v36, %v741_v30 }
 0x297   : > { %v644_v31 = vpop.permute.xlu1 %643  ;;  %v682_v45 = vrot.slane %v674_v37, %v4300_v1  ;;  %v689_v59 = vrot.slane %v675_v53, %v4300_v1 }
 0x298   : > { %v645_v34 = vrot.slane %v644_v31, 4  ;;  %v692_v35 = vcombine.low %v636_v21, %v644_v31  ;;  %v775_v41 = vrot.slane %v768_v33, %v4294_v16  ;;  %v750_v52 = vrot.slane %v742_v44, %v4300_v1 }
 0x299   : > { %v757_v63 = vrot.slane %v743_v58, %v4300_v1  ;;  %v690_v4 = vcombine.high %v682_v45, %v5934_v15  ;;  %v854_v5 = vrot.slane %v682_v45, %v853_v20  ;;  %v691_v7 = vcombine.high %v689_v59, %v5934_v15 }
 0x29a   : > { %v699_v39 = vrot.slane %v692_v35, %v4294_v16  ;;  %v760_v40 = vcombine.low %v637_v32, %v645_v34  ;;  %v862_v8 = vrot.slane %v689_v59, %v853_v20 }
 0x29b   : > { %v858_v6 = vrot.slane %v690_v4, %v853_v20  ;;  %v866_v10 = vrot.slane %v691_v7, %v853_v20 }
 0x29c   : > { %v708_v42 = vcombine.low %v699_v39, %v707_v38  ;;  %v767_v43 = vrot.slane %v760_v40, %v4294_v16  ;;  %v709_v48 = vcombine.high %v699_v39, %v707_v38 }
 0x29e   : > { %v776_v46 = vcombine.low %v767_v43, %v775_v41  ;;  %v716_v47 = vrot.slane %v708_v42, %v4300_v1  ;;  %v777_v54 = vcombine.high %v767_v43, %v775_v41  ;;  %v723_v57 = vrot.slane %v709_v48, %v4300_v1 }
 0x2a0   : > { %v784_v50 = vrot.slane %v776_v46, %v4300_v1  ;;  %v810_v51 = vcombine.low %v682_v45, %v716_v47  ;;  %v3401_v56 = vcombine.high %v682_v45, %v716_v47  ;;  %v791_v60 = vrot.slane %v777_v54, %v4300_v1 }
 0x2a1   : > { %v814_v62 = vcombine.low %v689_v59, %v723_v57  ;;  %v3403_v2 = vcombine.high %v689_v59, %v723_v57 }
 0x2a2   : > { %818 = vrot.lane.b32.xlu1 %v810_v51, %s4014_s17  ;;  %v811_v55 = vcombine.low %v750_v52, %v784_v50  ;;  %v3402_v61 = vcombine.high %v750_v52, %v784_v50  ;;  %v815_v0 = vcombine.low %v757_v63, %v791_v60  ;;  %v3404_v3 = vcombine.high %v757_v63, %v791_v60 }
 0x2a3   : > { %v792_v11 = vcombine.high %v784_v50, %v5934_v15  ;;  %v887_v12 = vrot.slane %v784_v50, %v886_v9  ;;  %v793_v14 = vcombine.high %v791_v60, %v5934_v15  ;;  %v895_v17 = vrot.slane %v791_v60, %v886_v9 }
 0x2a4   : > { %820 = vrot.lane.b32.xlu0 %v811_v55, %s4014_s17 }
 0x2a5   : > { %v891_v13 = vrot.slane %v792_v11, %v886_v9  ;;  %v899_v18 = vrot.slane %v793_v14, %v886_v9 }
 0x2a6   : > { %822 = vrot.lane.b32.xlu1 %v3401_v56, %s4014_s17 }
 0x2a8   : > { %824 = vrot.lane.b32.xlu0 %v3402_v61, %s4014_s17 }
 0x2aa   : > { %826 = vrot.lane.b32.xlu1 %v814_v62, %s4014_s17 }
 0x2ac   : > { %828 = vrot.lane.b32.xlu0 %v815_v0, %s4014_s17 }
 0x2ae   : > { %830 = vrot.lane.b32.xlu1 %v3403_v2, %s4014_s17 }
 0x2b0   : > { %832 = vrot.lane.b32.xlu0 %v3404_v3, %s4014_s17 }
 0x2b2   : > { %867 = vrot.lane.b32.xlu1 %v854_v5, %s4014_s17 }
 0x2b4   : > { %869 = vrot.lane.b32.xlu0 %v858_v6, %s4014_s17 }
 0x2b6   : > { %871 = vrot.lane.b32.xlu1 %v862_v8, %s4014_s17 }
 0x2b8   : > { %873 = vrot.lane.b32.xlu0 %v866_v10, %s4014_s17 }
 0x2ba   : > { %900 = vrot.lane.b32.xlu1 %v887_v12, %s4014_s17 }
 0x2bc   : > { %902 = vrot.lane.b32.xlu0 %v891_v13, %s4014_s17 }
 0x2be   : > { %904 = vrot.lane.b32.xlu1 %v895_v17, %s4014_s17 }
 0x2c0   : > { %906 = vrot.lane.b32.xlu0 %v899_v18, %s4014_s17 }
 0x314   : > { %v819_v49 = vpop.permute.xlu1 %818 }
 0x315   : > { %843 = vst.msk [vmem:[#allocation2 + $0x1] sm:$0xff] %vm842_vm11, %v819_v49 }
 0x316   : > { %v821_v19 = vpop.permute.xlu0 %820 }
 0x317   : > { %844 = vst.msk [vmem:[#allocation2 + $0x9] sm:$0xff] %vm842_vm11, %v821_v19 }
 0x318   : > { %v823_v21 = vpop.permute.xlu1 %822 }
 0x319   : > { %845 = vst.msk [vmem:[#allocation2 + $0x19] sm:$0xff] %vm842_vm11, %v823_v21 }
 0x31a   : > { %v825_v22 = vpop.permute.xlu0 %824 }
 0x31b   : > { %846 = vst.msk [vmem:[#allocation2 + $0x21] sm:$0xff] %vm842_vm11, %v825_v22 }
 0x31c   : > { %v827_v23 = vpop.permute.xlu1 %826 }
 0x31d   : > { %847 = vst.msk [vmem:[#allocation2 + $0x31] sm:$0xff] %vm842_vm11, %v827_v23 }
 0x31e   : > { %v829_v24 = vpop.permute.xlu0 %828  ;;  %v918_v41 = vld [vmem:[#allocation2 + $0x8] sm:$0xff] }
 0x31f   : > { %848 = vst.msk [vmem:[#allocation2 + $0x39] sm:$0xff] %vm842_vm11, %v829_v24 }
 0x320   : > { %v831_v25 = vpop.permute.xlu1 %830 }
 0x321   : > { %849 = vst.msk [vmem:[#allocation2 + $0x49] sm:$0xff] %vm842_vm11, %v831_v25 }
 0x322   : > { %v833_v26 = vpop.permute.xlu0 %832  ;;  %v921_v27 = vld [vmem:[#allocation2 + $0x20] sm:$0xff] }
 0x323   : > { %850 = vst.msk [vmem:[#allocation2 + $0x51] sm:$0xff] %vm842_vm11, %v833_v26  ;;  %949 = vrot.lane.b32.xlu0 %v921_v27, %s4015_s10 }
 0x324   : > { %v868_v28 = vpop.permute.xlu1 %867 }
 0x325   : > { %880 = vst.msk [vmem:[#allocation2 - $0x1] sm:$0x2] %vm879_vm12, %v868_v28 }
 0x326   : > { %v870_v29 = vpop.permute.xlu0 %869  ;;  %v924_v43 = vld [vmem:[#allocation2 + $0x38] sm:$0xff] }
 0x327   : > { %881 = vst.msk [vmem:[#allocation2 + $0x17] sm:$0x2] %vm879_vm12, %v870_v29 }
 0x328   : > { %v872_v30 = vpop.permute.xlu1 %871 }
 0x329   : > { %882 = vst.msk [vmem:[#allocation2 + $0x2f] sm:$0x2] %vm879_vm12, %v872_v30 }
 0x32a   : > { %v874_v31 = vpop.permute.xlu0 %873  ;;  %v927_v32 = vld [vmem:[#allocation2 + $0x50] sm:$0xff] }
 0x32b   : > { %883 = vst.msk [vmem:[#allocation2 + $0x47] sm:$0x2] %vm879_vm12, %v874_v31  ;;  %961 = vrot.lane.b32.xlu0 %v927_v32, %s4015_s10 }
 0x32c   : > { %v901_v33 = vpop.permute.xlu1 %900  ;;  %v917_v34 = vld [vmem:[#allocation2] sm:$0xff] }
 0x32d   : > { %913 = vst.msk [vmem:[#allocation2 + $0xf] sm:$0x4] %vm912_vm13, %v901_v33  ;;  %941 = vrot.lane.b32.xlu1 %v917_v34, %s4015_s10 }
 0x32e   : > { %v903_v35 = vpop.permute.xlu0 %902  ;;  %v920_v36 = vld [vmem:[#allocation2 + $0x18] sm:$0xff] }
 0x32f   : > { %914 = vst.msk [vmem:[#allocation2 + $0x27] sm:$0x4] %vm912_vm13, %v903_v35  ;;  %947 = vrot.lane.b32.xlu0 %v920_v36, %s4015_s10 }
 0x330   : > { %v905_v37 = vpop.permute.xlu1 %904  ;;  %v923_v38 = vld [vmem:[#allocation2 + $0x30] sm:$0xff] }
 0x331   : > { %915 = vst.msk [vmem:[#allocation2 + $0x3f] sm:$0x4] %vm912_vm13, %v905_v37  ;;  %953 = vrot.lane.b32.xlu1 %v923_v38, %s4015_s10 }
 0x332   : > { %v907_v39 = vpop.permute.xlu0 %906  ;;  %v926_v40 = vld [vmem:[#allocation2 + $0x48] sm:$0xff] }
 0x333   : > { %916 = vst.msk [vmem:[#allocation2 + $0x57] sm:$0x4] %vm912_vm13, %v907_v39  ;;  %959 = vrot.lane.b32.xlu0 %v926_v40, %s4015_s10 }
 0x334   : > { %v919_v45 = vld [vmem:[#allocation2 + $0x10] sm:$0x3] }
 0x335   : > { %943 = vrot.lane.b32.xlu1 %v918_v41, %s4015_s10 }
 0x336   : > { %v922_v42 = vld [vmem:[#allocation2 + $0x28] sm:$0x3] }
 0x337   : > { %951 = vrot.lane.b32.xlu0 %v922_v42, %s4015_s10 }
 0x338   : > { %v925_v46 = vld [vmem:[#allocation2 + $0x40] sm:$0x3] }
 0x339   : > { %955 = vrot.lane.b32.xlu1 %v924_v43, %s4015_s10 }
 0x33a   : > { %v928_v44 = vld [vmem:[#allocation2 + $0x58] sm:$0x3] }
 0x33b   : > { %963 = vrot.lane.b32.xlu0 %v928_v44, %s4015_s10 }
 0x33d   : > { %945 = vrot.lane.b32.xlu1 %v919_v45, %s4015_s10 }
 0x341   : > { %957 = vrot.lane.b32.xlu1 %v925_v46, %s4015_s10 }
 0x395   : > { %v950_v47 = vpop.permute.xlu0 %949 }
 0x396   : > { %983 = vst.msk [vmem:[#allocation2 + $0x20] sm:$0xff] %vm977_vm14, %v950_v47 }
 0x39d   : > { %v962_v48 = vpop.permute.xlu0 %961  ;;  %v995_v50 = vld [vmem:[#allocation2 + $0x20] sm:$0xff] }
 0x39e   : > { %989 = vst.msk [vmem:[#allocation2 + $0x50] sm:$0xff] %vm977_vm14, %v962_v48  ;;  %1023 = vrot.lane.b32.xlu0 %v995_v50, %s4016_s16 }
 0x39f   : > { %v942_v51 = vpop.permute.xlu1 %941 }
 0x3a0   : > { %978 = vst.msk [vmem:[#allocation2] sm:$0xff] %vm977_vm14, %v942_v51 }
 0x3a1   : > { %v948_v52 = vpop.permute.xlu0 %947 }
 0x3a2   : > { %982 = vst.msk [vmem:[#allocation2 + $0x18] sm:$0xff] %vm977_vm14, %v948_v52 }
 0x3a3   : > { %v954_v53 = vpop.permute.xlu1 %953 }
 0x3a4   : > { %985 = vst.msk [vmem:[#allocation2 + $0x30] sm:$0xff] %vm977_vm14, %v954_v53 }
 0x3a5   : > { %v960_v54 = vpop.permute.xlu0 %959  ;;  %v1001_v55 = vld [vmem:[#allocation2 + $0x50] sm:$0xff] }
 0x3a6   : > { %988 = vst.msk [vmem:[#allocation2 + $0x48] sm:$0xff] %vm977_vm14, %v960_v54  ;;  %1035 = vrot.lane.b32.xlu0 %v1001_v55, %s4016_s16 }
 0x3a7   : > { %v944_v56 = vpop.permute.xlu1 %943  ;;  %v991_v57 = vld [vmem:[#allocation2] sm:$0xff] }
 0x3a8   : > { %979 = vst.msk [vmem:[#allocation2 + $0x8] sm:$0xff] %vm977_vm14, %v944_v56  ;;  %1015 = vrot.lane.b32.xlu1 %v991_v57, %s4016_s16 }
 0x3a9   : > { %v952_v58 = vpop.permute.xlu0 %951  ;;  %v994_v59 = vld [vmem:[#allocation2 + $0x18] sm:$0xff] }
 0x3aa   : > { %984 = vst.msk [vmem:[#allocation2 + $0x28] sm:$0x3] %vm980_vm15, %v952_v58  ;;  %1021 = vrot.lane.b32.xlu0 %v994_v59, %s4016_s16 }
 0x3ab   : > { %v956_v60 = vpop.permute.xlu1 %955  ;;  %v997_v61 = vld [vmem:[#allocation2 + $0x30] sm:$0xff] }
 0x3ac   : > { %986 = vst.msk [vmem:[#allocation2 + $0x38] sm:$0xff] %vm977_vm14, %v956_v60  ;;  %1027 = vrot.lane.b32.xlu1 %v997_v61, %s4016_s16 }
 0x3ad   : > { %v964_v62 = vpop.permute.xlu0 %963  ;;  %v1000_v63 = vld [vmem:[#allocation2 + $0x48] sm:$0xff] }
 0x3ae   : > { %990 = vst.msk [vmem:[#allocation2 + $0x58] sm:$0x3] %vm980_vm15, %v964_v62  ;;  %1033 = vrot.lane.b32.xlu0 %v1000_v63, %s4016_s16 }
 0x3af   : > { %v946_v0 = vpop.permute.xlu1 %945  ;;  %v992_v2 = vld [vmem:[#allocation2 + $0x8] sm:$0xff] }
 0x3b0   : > { %981 = vst.msk [vmem:[#allocation2 + $0x10] sm:$0x3] %vm980_vm15, %v946_v0  ;;  %1017 = vrot.lane.b32.xlu1 %v992_v2, %s4016_s16 }
 0x3b1   : > { %v996_v20 = vld [vmem:[#allocation2 + $0x28] sm:$0x3] }
 0x3b2   : > { %1025 = vrot.lane.b32.xlu0 %v996_v20, %s4016_s16 }
 0x3b3   : > { %v958_v3 = vpop.permute.xlu1 %957  ;;  %v998_v4 = vld [vmem:[#allocation2 + $0x38] sm:$0xff] }
 0x3b4   : > { %987 = vst.msk [vmem:[#allocation2 + $0x40] sm:$0x3] %vm980_vm15, %v958_v3  ;;  %1029 = vrot.lane.b32.xlu1 %v998_v4, %s4016_s16 }
 0x3b5   : > { %v1002_v5 = vld [vmem:[#allocation2 + $0x58] sm:$0x3] }
 0x3b6   : > { %1037 = vrot.lane.b32.xlu0 %v1002_v5, %s4016_s16 }
 0x3b7   : > { %v993_v6 = vld [vmem:[#allocation2 + $0x10] sm:$0x3] }
 0x3b8   : > { %1019 = vrot.lane.b32.xlu1 %v993_v6, %s4016_s16 }
 0x3bb   : > { %v999_v7 = vld [vmem:[#allocation2 + $0x40] sm:$0x3] }
 0x3bc   : > { %1031 = vrot.lane.b32.xlu1 %v999_v7, %s4016_s16 }
 0x410   : > { %v1024_v8 = vpop.permute.xlu0 %1023 }
 0x411   : > { %1057 = vst.msk [vmem:[#allocation2 + $0x20] sm:$0xff] %vm1051_vm0, %v1024_v8 }
 0x418   : > { %v1036_v9 = vpop.permute.xlu0 %1035  ;;  %v4386_v10 = vld [vmem:[#allocation2 + $0x20] sm:$0xff] }
 0x419   : > { %1063 = vst.msk [vmem:[#allocation2 + $0x50] sm:$0xff] %vm1051_vm0, %v1036_v9  ;;  %1299 = vrot.lane.b32.xlu0 %v4386_v10, %s4017_s20 }
 0x41a   : > { %v1016_v11 = vpop.permute.xlu1 %1015 }
 0x41b   : > { %1052 = vst.msk [vmem:[#allocation2] sm:$0xff] %vm1051_vm0, %v1016_v11 }
 0x41c   : > { %v1022_v12 = vpop.permute.xlu0 %1021 }
 0x41d   : > { %1056 = vst.msk [vmem:[#allocation2 + $0x18] sm:$0xff] %vm1051_vm0, %v1022_v12 }
 0x41e   : > { %v1028_v13 = vpop.permute.xlu1 %1027 }
 0x41f   : > { %1059 = vst.msk [vmem:[#allocation2 + $0x30] sm:$0xff] %vm1051_vm0, %v1028_v13 }
 0x420   : > { %v1034_v14 = vpop.permute.xlu0 %1033  ;;  %v4394_v17 = vld [vmem:[#allocation2 + $0x50] sm:$0xff] }
 0x421   : > { %1062 = vst.msk [vmem:[#allocation2 + $0x48] sm:$0xff] %vm1051_vm0, %v1034_v14  ;;  %1307 = vrot.lane.b32.xlu0 %v4394_v17, %s4017_s20  ;;  %v1157_v18 = vcombine.low %v4386_v10, %v4394_v17  ;;  %v1158_v49 = vcombine.high %v4386_v10, %v4394_v17 }
 0x422   : > { %v1018_v19 = vpop.permute.xlu1 %1017  ;;  %v1065_v21 = vld [vmem:[#allocation2] sm:$0xff] }
 0x423   : > { %1053 = vst.msk [vmem:[#allocation2 + $0x8] sm:$0xff] %vm1051_vm0, %v1018_v19  ;;  %1293 = vrot.lane.b32.xlu1 %v1065_v21, %s4017_s20  ;;  %v4472_v59 = vrot.slane %v1157_v18, %v4294_v16  ;;  %v4507_v8 = vrot.slane %v1158_v49, %v4294_v16 }
 0x424   : > { %v1026_v22 = vpop.permute.xlu0 %1025  ;;  %v4405_v23 = vld [vmem:[#allocation2 + $0x18] sm:$0xff] }
 0x425   : > { %1058 = vst.msk [vmem:[#allocation2 + $0x28] sm:$0x3] %vm1054_vm2, %v1026_v22  ;;  %1297 = vrot.lane.b32.xlu0 %v4405_v23, %s4017_s20  ;;  %v4425_v34 = vld [vmem:[#allocation2 + $0x19] sm:$0xff]  ;;  %5997 = vst [vmem:[#allocation17_spill] sm:$0xff] %v4472_v59 }
 0x426   : > { %v1030_v24 = vpop.permute.xlu1 %1029  ;;  %v1069_v25 = vld [vmem:[#allocation2 + $0x30] sm:$0xff]  ;;  %v4427_v35 = vld [vmem:[#allocation2 + $0x1a] sm:$0xff] }
 0x427   : > { %1060 = vst.msk [vmem:[#allocation2 + $0x38] sm:$0xff] %vm1051_vm0, %v1030_v24  ;;  %1301 = vrot.lane.b32.xlu1 %v1069_v25, %s4017_s20  ;;  %v1073_v26 = vcombine.low %v1065_v21, %v1069_v25  ;;  %v1074_v27 = vcombine.high %v1065_v21, %v1069_v25 }
 0x428   : > { %v1038_v28 = vpop.permute.xlu0 %1037  ;;  %v4412_v29 = vld [vmem:[#allocation2 + $0x48] sm:$0xff] }
 0x429   : > { %v4414_v30 = vld [vmem:[#allocation2 + $0x49] sm:$0xff]  ;;  %1064 = vst.msk [vmem:[#allocation2 + $0x58] sm:$0x3] %vm1054_vm2, %v1038_v28  ;;  %1305 = vrot.lane.b32.xlu0 %v4412_v29, %s4017_s20  ;;  %v1089_v32 = vcombine.low %v4405_v23, %v4412_v29  ;;  %v1090_v33 = vcombine.high %v4405_v23, %v4412_v29  ;;  %v4438_v41 = vrot.slane %v1073_v26, %v4294_v16 }
 0x42a   : > { %v4416_v31 = vld [vmem:[#allocation2 + $0x4a] sm:$0xff]  ;;  %v1020_v36 = vpop.permute.xlu1 %1019  ;;  %v1777_v37 = vcombine.low %v4425_v34, %v4414_v30  ;;  %v1778_v38 = vcombine.high %v4425_v34, %v4414_v30  ;;  %v4441_v42 = vrot.slane %v1074_v27, %v4294_v16  ;;  %v4461_v53 = vld [vmem:[#allocation2 + $0x1] sm:$0xff] }
 0x42b   : > { %v4444_v43 = vrot.slane %v1089_v32, %v4294_v16  ;;  %v4447_v44 = vrot.slane %v1090_v33, %v4294_v16  ;;  %1055 = vst.msk [vmem:[#allocation2 + $0x10] sm:$0x3] %vm1054_vm2, %v1020_v36  ;;  %1523 = vrot.lane.b32.xlu1 %v1065_v21, %s4015_s10  ;;  %v1066_v46 = vld [vmem:[#allocation2 + $0x8] sm:$0xff] }
 0x42c   : > { %v4482_v62 = vrot.slane %v1777_v37, %v4294_v16  ;;  %v1756_v2 = vld [vmem:[#allocation2 + $0x21] sm:$0xff]  ;;  %v4499_v6 = vrot.slane %v1778_v38, %v4294_v16 }
 0x42d   : > { %1529 = vrot.lane.b32.xlu0 %v4386_v10, %s4015_s10  ;;  %v1106_v47 = vcombine.high %v4438_v41, %v4444_v43  ;;  %v4582_v37 = vld [vmem:[#allocation2 + $0x2] sm:$0xff] }
 0x42e   : > { %v1032_v51 = vpop.permute.xlu1 %1031  ;;  %v1070_v52 = vld [vmem:[#allocation2 + $0x38] sm:$0xff] }
 0x42f   : > { %v4463_v54 = vld [vmem:[#allocation2 + $0x31] sm:$0xff]  ;;  %1061 = vst.msk [vmem:[#allocation2 + $0x40] sm:$0x3] %vm1054_vm2, %v1032_v51  ;;  %1531 = vrot.lane.b32.xlu1 %v1069_v25, %s4015_s10  ;;  %v1141_v55 = vcombine.low %v1066_v46, %v1070_v52  ;;  %v1142_v56 = vcombine.high %v1066_v46, %v1070_v52 }
 0x430   : > { %v1761_v57 = vcombine.low %v4461_v53, %v4463_v54  ;;  %v1762_v58 = vcombine.high %v4461_v53, %v4463_v54  ;;  %v4474_v60 = vld [vmem:[#allocation2 + $0x51] sm:$0xff] }
 0x431   : > { %1537 = vrot.lane.b32.xlu0 %v4394_v17, %s4015_s10  ;;  %v4479_v61 = vrot.slane %v1141_v55, %v4294_v16  ;;  %v4491_v20 = vrot.slane %v1142_v56, %v4294_v16  ;;  %v1845_v3 = vcombine.low %v1756_v2, %v4474_v60  ;;  %v1846_v4 = vcombine.high %v1756_v2, %v4474_v60  ;;  %v4599_v38 = vld [vmem:[#allocation2 + $0x52] sm:$0xff] }
 0x432   : > { %v4485_v63 = vrot.slane %v1761_v57, %v4294_v16  ;;  %v4488_v0 = vrot.slane %v1762_v58, %v4294_v16  ;;  %v1754_v11 = vld [vmem:[#allocation2 + $0x9] sm:$0xff]  ;;  %5999 = vst [vmem:[#allocation19_spill] sm:$0xff] %v4599_v38 }
 0x433   : > { %1295 = vrot.lane.b32.xlu1 %v1066_v46, %s4017_s20  ;;  %v1174_v12 = vcombine.high %v4479_v61, %v4472_v59  ;;  %v4517_v18 = vld [vmem:[#allocation2 + $0xa] sm:$0xff]  ;;  %v4541_v27 = vrot.slane %v1845_v3, %v4294_v16  ;;  %v4544_v28 = vrot.slane %v1846_v4, %v4294_v16 }
 0x434   : > { %v1794_v9 = vcombine.high %v4485_v63, %v4482_v62 }
 0x435   : > { %1527 = vrot.lane.b32.xlu0 %v4405_v23, %s4015_s10 }
 0x436   : > { %v1758_v14 = vld [vmem:[#allocation2 + $0x39] sm:$0xff] }
 0x437   : > { %v4519_v19 = vld [vmem:[#allocation2 + $0x3a] sm:$0xff]  ;;  %1303 = vrot.lane.b32.xlu1 %v1070_v52, %s4017_s20  ;;  %v1829_v21 = vcombine.low %v1754_v11, %v1758_v14  ;;  %v1830_v22 = vcombine.high %v1754_v11, %v1758_v14 }
 0x439   : > { %1535 = vrot.lane.b32.xlu0 %v4412_v29, %s4015_s10  ;;  %v4535_v25 = vrot.slane %v1829_v21, %v4294_v16  ;;  %v4538_v26 = vrot.slane %v1830_v22, %v4294_v16 }
 0x43b   : > { %1525 = vrot.lane.b32.xlu1 %v1066_v46, %s4015_s10  ;;  %v1862_v29 = vcombine.high %v4535_v25, %v4541_v27 }
 0x43d   : > { %2209 = vrot.lane.b32.xlu0 %v4425_v34, %s4015_s10 }
 0x43f   : > { %1533 = vrot.lane.b32.xlu1 %v1070_v52, %s4015_s10 }
 0x441   : > { %2217 = vrot.lane.b32.xlu0 %v4414_v30, %s4015_s10 }
 0x443   : > { %2207 = vrot.lane.b32.xlu1 %v1754_v11, %s4015_s10 }
 0x445   : > { %2661 = vrot.lane.b32.xlu0 %v4427_v35, %s4017_s20 }
 0x447   : > { %2215 = vrot.lane.b32.xlu1 %v1758_v14, %s4015_s10 }
 0x449   : > { %2669 = vrot.lane.b32.xlu0 %v4416_v31, %s4017_s20 }
 0x44b   : > { %2659 = vrot.lane.b32.xlu1 %v4517_v18, %s4017_s20 }
 0x44d   : > { %1979 = vrot.lane.b32.xlu0 %v4425_v34, %s4017_s20  ;;  %v4594_v34 = vld [vmem:[#allocation2 + $0x22] sm:$0xff] }
 0x44e   : > { %5998 = vst [vmem:[#allocation18_spill] sm:$0xff] %v4594_v34 }
 0x44f   : > { %2667 = vrot.lane.b32.xlu1 %v4519_v19, %s4017_s20 }
 0x451   : > { %1987 = vrot.lane.b32.xlu0 %v4414_v30, %s4017_s20  ;;  %v4587_v30 = vld [vmem:[#allocation2 + $0x32] sm:$0xff] }
 0x453   : > { %2205 = vrot.lane.b32.xlu1 %v4461_v53, %s4015_s10 }
 0x455   : > { %2891 = vrot.lane.b32.xlu0 %v4427_v35, %s4015_s10 }
 0x457   : > { %2213 = vrot.lane.b32.xlu1 %v4463_v54, %s4015_s10 }
 0x459   : > { %2899 = vrot.lane.b32.xlu0 %v4416_v31, %s4015_s10 }
 0x45b   : > { %2657 = vrot.lane.b32.xlu1 %v4582_v37, %s4017_s20 }
 0x45d   : > { %2211 = vrot.lane.b32.xlu0 %v1756_v2, %s4015_s10 }
 0x45f   : > { %2665 = vrot.lane.b32.xlu1 %v4587_v30, %s4017_s20 }
 0x461   : > { %2219 = vrot.lane.b32.xlu0 %v4474_v60, %s4015_s10 }
 0x463   : > { %1977 = vrot.lane.b32.xlu1 %v1754_v11, %s4017_s20 }
 0x465   : > { %2663 = vrot.lane.b32.xlu0 %v4594_v34, %s4017_s20 }
 0x467   : > { %1985 = vrot.lane.b32.xlu1 %v1758_v14, %s4017_s20 }
 0x469   : > { %2671 = vrot.lane.b32.xlu0 %v4599_v38, %s4017_s20 }
 0x46b   : > { %1975 = vrot.lane.b32.xlu1 %v4461_v53, %s4017_s20 }
 0x46d   : > { %1981 = vrot.lane.b32.xlu0 %v1756_v2, %s4017_s20 }
 0x46f   : > { %1983 = vrot.lane.b32.xlu1 %v4463_v54, %s4017_s20 }
 0x471   : > { %1989 = vrot.lane.b32.xlu0 %v4474_v60, %s4017_s20 }
 0x473   : > { %2889 = vrot.lane.b32.xlu1 %v4517_v18, %s4015_s10 }
 0x475   : > { %2893 = vrot.lane.b32.xlu0 %v4594_v34, %s4015_s10 }
 0x477   : > { %2897 = vrot.lane.b32.xlu1 %v4519_v19, %s4015_s10 }
 0x479   : > { %2901 = vrot.lane.b32.xlu0 %v4599_v38, %s4015_s10 }
 0x47b   : > { %2887 = vrot.lane.b32.xlu1 %v4582_v37, %s4015_s10 }
 0x47f   : > { %2895 = vrot.lane.b32.xlu1 %v4587_v30, %s4015_s10 }
 0x48b   : > { %v1300_v46 = vpop.permute.xlu0 %1299 }
 0x493   : > { %v1308_v51 = vpop.permute.xlu0 %1307 }
 0x494   : > { %v1401_v23 = vcombine.low %v1300_v46, %v1308_v51 }
 0x495   : > { %v1294_v52 = vpop.permute.xlu1 %1293 }
 0x496   : > { %v4631_v32 = vrot.slane %v1401_v23, %v4294_v16 }
 0x497   : > { %v1298_v53 = vpop.permute.xlu0 %1297 }
 0x499   : > { %v1302_v54 = vpop.permute.xlu1 %1301 }
 0x49a   : > { %v1317_v55 = vcombine.low %v1294_v52, %v1302_v54 }
 0x49b   : > { %v1306_v56 = vpop.permute.xlu0 %1305 }
 0x49c   : > { %v1333_v57 = vcombine.low %v1298_v53, %v1306_v56  ;;  %v4623_v60 = vrot.slane %v1317_v55, %v4294_v16  ;;  %v1334_v49 = vcombine.high %v1298_v53, %v1306_v56 }
 0x49d   : > { %v1524_v58 = vpop.permute.xlu1 %1523 }
 0x49e   : > { %v4626_v2 = vrot.slane %v1333_v57, %v4294_v16  ;;  %v1348_v48 = vrot.slane %v1334_v49, %v4294_v16 }
 0x49f   : > { %v1530_v3 = vpop.permute.xlu0 %1529 }
 0x4a0   : > { %v1350_v15 = vcombine.high %v4623_v60, %v4626_v2 }
 0x4a1   : > { %v1532_v11 = vpop.permute.xlu1 %1531 }
 0x4a2   : > { %v1547_v24 = vcombine.low %v1524_v58, %v1532_v11  ;;  %v4660_v56 = vrot.slane %v1350_v15, %v4300_v1  ;;  %v4676_v15 = vrot.slane %v1794_v9, %v4300_v1 }
 0x4a3   : > { %v1538_v14 = vpop.permute.xlu0 %1537 }
 0x4a4   : > { %v1631_v17 = vcombine.low %v1530_v3, %v1538_v14  ;;  %v4657_v40 = vrot.slane %v1547_v24, %v4294_v16  ;;  %v3525_v9 = vpack.i.bf16 %v4676_v15, %v4660_v56 }
 0x4a5   : > { %v1296_v21 = vpop.permute.xlu1 %1295 }
 0x4a7   : > { %v1528_v22 = vpop.permute.xlu0 %1527 }
 0x4a9   : > { %v1304_v5 = vpop.permute.xlu1 %1303 }
 0x4aa   : > { %v1385_v7 = vcombine.low %v1296_v21, %v1304_v5  ;;  %v1386_v39 = vcombine.high %v1296_v21, %v1304_v5  ;;  %v4654_v5 = vrot.slane %v1862_v29, %v4300_v1  ;;  %v1318_v21 = vcombine.high %v1294_v52, %v1302_v54 }
 0x4ab   : > { %v1536_v45 = vpop.permute.xlu0 %1535  ;;  %v4680_v54 = vrot.slane %v1631_v17, %v4294_v16 }
 0x4ac   : > { %v4634_v55 = vrot.slane %v1385_v7, %v4294_v16  ;;  %v1563_v57 = vcombine.low %v1528_v22, %v1536_v45  ;;  %v1402_v7 = vcombine.high %v1300_v46, %v1308_v51  ;;  %6001 = vst [vmem:[#allocation21_spill] sm:$0xff] %v4654_v5  ;;  %v4663_v46 = vrot.slane %v1386_v39, %v4294_v16 }
 0x4ad   : > { %v1526_v4 = vpop.permute.xlu1 %1525  ;;  %v1564_v51 = vcombine.high %v1528_v22, %v1536_v45  ;;  %v1548_v45 = vcombine.high %v1524_v58, %v1532_v11  ;;  %v1632_v22 = vcombine.high %v1530_v3, %v1538_v14 }
 0x4ae   : > { %v1418_v50 = vcombine.high %v4634_v55, %v4631_v32  ;;  %v4643_v23 = vrot.slane %v1563_v57, %v4294_v16  ;;  %v1416_v39 = vrot.slane %v1402_v7, %v4294_v16 }
 0x4af   : > { %v4645_v36 = vpop.permute.xlu0 %2209  ;;  %v1578_v58 = vrot.slane %v1564_v51, %v4294_v16  ;;  %v1562_v14 = vrot.slane %v1548_v45, %v4294_v16  ;;  %v4709_v51 = vrot.slane %v1174_v12, %v4300_v1 }
 0x4b0   : > { %v4648_v10 = vrot.slane %v1418_v50, %v4300_v1  ;;  %v1580_v29 = vcombine.high %v4657_v40, %v4643_v23  ;;  %v1433_v13 = vcombine.low %v4663_v46, %v1416_v39 }
 0x4b1   : > { %v1534_v53 = vpop.permute.xlu1 %1533  ;;  %6004 = vst [vmem:[#allocation24_spill] sm:$0xff] %v4709_v51  ;;  %v1595_v45 = vcombine.low %v1562_v14, %v1578_v58 }
 0x4b2   : > { %6000 = vst [vmem:[#allocation20_spill] sm:$0xff] %v4648_v10  ;;  %v1615_v50 = vcombine.low %v1526_v4, %v1534_v53  ;;  %v3520_v57 = vpack.i.bf16 %v4654_v5, %v4648_v10  ;;  %v1616_v52 = vcombine.high %v1526_v4, %v1534_v53  ;;  %v1332_v4 = vrot.slane %v1318_v21, %v4294_v16 }
 0x4b3   : > { %v4670_v24 = vpop.permute.xlu0 %2217  ;;  %v4701_v3 = vrot.slane %v1580_v29, %v4300_v1  ;;  %v4721_v29 = vrot.slane %v1106_v47, %v4300_v1  ;;  %v4726_v12 = vrot.slane %v1433_v13, %v4300_v1  ;;  %v6010_v47 = vcombine.low %v4538_v26, %v4544_v28 }
 0x4b4   : > { %v4683_v49 = vrot.slane %v1615_v50, %v4294_v16  ;;  %3521 = vrot.lane.b32.xlu1 %v3520_v57, %s4011_s29  ;;  %v1365_v7 = vcombine.low %v1332_v4, %v1348_v48  ;;  %v1630_v50 = vrot.slane %v1616_v52, %v4294_v16  ;;  %v1646_v52 = vrot.slane %v1632_v22, %v4294_v16 }
 0x4b5   : > { %v4687_v53 = vpop.permute.xlu1 %2207  ;;  %6003 = vst [vmem:[#allocation23_spill] sm:$0xff] %v4701_v3  ;;  %6007 = vst [vmem:[#allocation27_spill] sm:$0xff] %v4721_v29  ;;  %v3540_v22 = vpack.i.bf16 %v4701_v3, %v4721_v29  ;;  %v4740_v10 = vrot.slane %v6010_v47, %v4300_v1  ;;  %v4754_v3 = vrot.slane %v1595_v45, %v4300_v1 }
 0x4b6   : > { %6002 = vst [vmem:[#allocation22_spill] sm:$0xff] %v4687_v53  ;;  %v1648_v11 = vcombine.high %v4683_v49, %v4680_v54  ;;  %6008 = vst [vmem:[#allocation28_spill] sm:$0xff] %v4726_v12  ;;  %v1663_v33 = vcombine.low %v1630_v50, %v1646_v52  ;;  %v4733_v5 = vrot.slane %v1365_v7, %v4300_v1 }
 0x4b7   : > { %v4698_v21 = vpop.permute.xlu0 %2661  ;;  %6011 = vst [vmem:[#allocation30_spill] sm:$0xff] %v4740_v10  ;;  %v1366_v7 = vcombine.high %v1332_v4, %v1348_v48  ;;  %6014 = vst [vmem:[#allocation32_spill] sm:$0xff] %v4754_v3  ;;  %v1434_v47 = vcombine.high %v4663_v46, %v1416_v39  ;;  %v6015_v48 = vcombine.low %v4441_v42, %v4447_v44 }
 0x4b8   : > { %3526 = vrot.lane.b32.xlu1 %v3525_v9, %s4011_s29  ;;  %v4712_v57 = vrot.slane %v1648_v11, %v4300_v1  ;;  %6009 = vst [vmem:[#allocation29_spill] sm:$0xff] %v4733_v5  ;;  %v4762_v59 = vrot.slane %v1663_v33, %v4300_v1  ;;  %v6017_v46 = vcombine.low %v4491_v20, %v4507_v8 }
 0x4b9   : > { %v4715_v17 = vpop.permute.xlu1 %2215  ;;  %v4769_v4 = vrot.slane %v6015_v48, %v4300_v1  ;;  %v1664_v33 = vcombine.high %v1630_v50, %v1646_v52  ;;  %v4790_v48 = vrot.slane %v1434_v47, %v4300_v1  ;;  %v6019_v50 = vcombine.high %v4488_v0, %v4499_v6 }
 0x4ba   : > { %6005 = vst [vmem:[#allocation25_spill] sm:$0xff] %v4712_v57  ;;  %6006 = vst [vmem:[#allocation26_spill] sm:$0xff] %v4715_v17  ;;  %v3530_v9 = vpack.i.bf16 %v4712_v57, %v4709_v51  ;;  %v6012_v51 = vcombine.low %v4488_v0, %v4499_v6  ;;  %v4778_v39 = vrot.slane %v6017_v46, %v4300_v1 }
 0x4bb   : > { %v4728_v11 = vpop.permute.xlu0 %2669  ;;  %6016 = vst [vmem:[#allocation33_spill] sm:$0xff] %v4769_v4  ;;  %v3560_v45 = vpack.i.bf16 %v4754_v3, %v4769_v4  ;;  %v4797_v52 = vrot.slane %v6019_v50, %v4300_v1  ;;  %v6021_v46 = vcombine.high %v4538_v26, %v4544_v28  ;;  %v1596_v47 = vcombine.high %v1562_v14, %v1578_v58 }
 0x4bc   : > { %3531 = vrot.lane.b32.xlu0 %v3530_v9, %s4011_s29  ;;  %3541 = vrot.lane.b32.xlu1 %v3540_v22, %s4011_s29  ;;  %v4749_v29 = vrot.slane %v6012_v51, %v4300_v1  ;;  %v3535_v9 = vpack.i.bf16 %v4740_v10, %v4726_v12  ;;  %v4811_v10 = vrot.slane %v1664_v33, %v4300_v1 }
 0x4bd   : > { %v4743_v13 = vpop.permute.xlu1 %2659  ;;  %6020 = vst [vmem:[#allocation35_spill] sm:$0xff] %v4797_v52  ;;  %v6024_v26 = vcombine.high %v4491_v20, %v4507_v8  ;;  %v4834_v50 = vrot.slane %v1596_v47, %v4300_v1  ;;  %v6029_v8 = vcombine.high %v4441_v42, %v4447_v44  ;;  %v2444_v42 = vcombine.high %v4582_v37, %v4587_v30 }
 0x4be   : > { %6013 = vst [vmem:[#allocation31_spill] sm:$0xff] %v4749_v29  ;;  %v3545_v22 = vpack.i.bf16 %v4749_v29, %v4733_v5  ;;  %v4806_v5 = vrot.slane %v6021_v46, %v4300_v1  ;;  %6023 = vst [vmem:[#allocation37_spill] sm:$0xff] %v4811_v10  ;;  %v6038_v12 = vcombine.low %v4427_v35, %v4416_v31 }
 0x4bf   : > { %v4757_v57 = vpop.permute.xlu0 %1979  ;;  %v4824_v28 = vrot.slane %v6024_v26, %v4300_v1  ;;  %6026 = vst [vmem:[#allocation39_spill] sm:$0xff] %v4834_v50 }
 0x4c0   : > { %3536 = vrot.lane.b32.xlu0 %v3535_v9, %s4009_s14  ;;  %3546 = vrot.lane.b32.xlu1 %v3545_v22, %s4009_s14  ;;  %v4783_v9 = vrot.slane %v1366_v7, %v4300_v1  ;;  %v3550_v22 = vpack.i.bf16 %v4762_v59, %v4778_v39  ;;  %6022 = vst [vmem:[#allocation36_spill] sm:$0xff] %v4806_v5 }
 0x4c1   : > { %v4772_v51 = vpop.permute.xlu1 %2667  ;;  %v3555_v6 = vpack.i.bf16 %v4806_v5, %v4790_v48  ;;  %6025 = vst [vmem:[#allocation38_spill] sm:$0xff] %v4824_v28  ;;  %v3575_v33 = vpack.i.bf16 %v4811_v10, %v4824_v28 }
 0x4c2   : > { %6018 = vst [vmem:[#allocation34_spill] sm:$0xff] %v4783_v9 }
 0x4c3   : > { %v4785_v29 = vpop.permute.xlu0 %1987 }
 0x4c4   : > { %3561 = vrot.lane.b32.xlu0 %v3560_v45, %s4009_s14  ;;  %3551 = vrot.lane.b32.xlu1 %v3550_v22, %s4009_s14  ;;  %v3565_v45 = vpack.i.bf16 %v4797_v52, %v4783_v9  ;;  %v2245_v22 = vcombine.low %v4645_v36, %v4670_v24  ;;  %v4877_v52 = vrot.slane %v2444_v42, %v4294_v16 }
 0x4c5   : > { %v4800_v7 = vpop.permute.xlu1 %2205 }
 0x4c7   : > { %v4813_v0 = vpop.permute.xlu0 %2891 }
 0x4c8   : > { %3566 = vrot.lane.b32.xlu0 %v3565_v45, %s4005_s11  ;;  %3556 = vrot.lane.b32.xlu1 %v3555_v6, %s4005_s11  ;;  %v4839_v45 = vrot.slane %v2245_v22, %v4294_v16  ;;  %v4849_v6 = vrot.slane %v6029_v8, %v4300_v1  ;;  %v2443_v8 = vcombine.low %v4582_v37, %v4587_v30 }
 0x4c9   : > { %v4827_v58 = vpop.permute.xlu1 %2213 }
 0x4ca   : > { %v2229_v14 = vcombine.low %v4800_v7, %v4827_v58  ;;  %6027 = vst [vmem:[#allocation40_spill] sm:$0xff] %v4839_v45  ;;  %6030 = vst [vmem:[#allocation42_spill] sm:$0xff] %v4849_v6  ;;  %v3580_v28 = vpack.i.bf16 %v4834_v50, %v4849_v6  ;;  %v4884_v30 = vrot.slane %v2443_v8, %v4294_v16 }
 0x4cb   : > { %v4836_v46 = vpop.permute.xlu0 %2899 }
 0x4cc   : > { %v4842_v20 = vrot.slane %v2229_v14, %v4294_v16  ;;  %3576 = vrot.lane.b32.xlu0 %v3575_v33, %s4005_s11  ;;  %v2697_v14 = vcombine.low %v4698_v21, %v4728_v11  ;;  %6036 = vst [vmem:[#allocation48_spill] sm:$0xff] %v4884_v30 }
 0x4cd   : > { %v2658_v26 = vpop.permute.xlu1 %2657 }
 0x4ce   : > { %6028 = vst [vmem:[#allocation41_spill] sm:$0xff] %v4842_v20  ;;  %v4867_v47 = vrot.slane %v2697_v14, %v4294_v16  ;;  %v2262_v6 = vcombine.high %v4842_v20, %v4839_v45 }
 0x4cf   : > { %v4855_v22 = vpop.permute.xlu0 %2211 }
 0x4d0   : > { %6031 = vst [vmem:[#allocation43_spill] sm:$0xff] %v4855_v22  ;;  %3581 = vrot.lane.b32.xlu0 %v3580_v28, %s4005_s11  ;;  %6033 = vst [vmem:[#allocation45_spill] sm:$0xff] %v4867_v47  ;;  %v2276_v42 = vrot.slane %v2262_v6, %v4300_v1 }
 0x4d1   : > { %v2666_v33 = vpop.permute.xlu1 %2665 }
 0x4d2   : > { %v2681_v44 = vcombine.low %v2658_v26, %v2666_v33 }
 0x4d3   : > { %v4864_v10 = vpop.permute.xlu0 %2219 }
 0x4d4   : > { %6032 = vst [vmem:[#allocation44_spill] sm:$0xff] %v4864_v10  ;;  %v4872_v50 = vrot.slane %v2681_v44, %v4294_v16  ;;  %v6037_v44 = vcombine.high %v4427_v35, %v4416_v31  ;;  %v6040_v31 = vcombine.high %v4517_v18, %v4519_v19 }
 0x4d5   : > { %v4874_v28 = vpop.permute.xlu1 %1977 }
 0x4d6   : > { %6034 = vst [vmem:[#allocation46_spill] sm:$0xff] %v4872_v50  ;;  %6035 = vst [vmem:[#allocation47_spill] sm:$0xff] %v4874_v28  ;;  %v2714_v37 = vcombine.high %v4872_v50, %v4867_v47  ;;  %v4892_v45 = vrot.slane %v6037_v44, %v4294_v16  ;;  %v4900_v47 = vrot.slane %v6038_v12, %v4294_v16 }
 0x4d7   : > { %v4886_v14 = vpop.permute.xlu0 %2663  ;;  %v2528_v50 = vcombine.high %v4594_v34, %v4599_v38  ;;  %v4918_v35 = vrot.slane %v6040_v31, %v4294_v16  ;;  %v2682_v12 = vcombine.high %v2658_v26, %v2666_v33  ;;  %v6041_v34 = vmov 0.0  }
 0x4d8   : > { %v2728_v20 = vrot.slane %v2714_v37, %v4300_v1  ;;  %6039 = vst [vmem:[#allocation49_spill] sm:$0xff] %v4900_v47  ;;  %v2491_v6 = vcombine.low %v4877_v52, %v4892_v45  ;;  %v2476_v37 = vcombine.high %v4884_v30, %v4900_v47  ;;  %v4922_v38 = vcombine.high %v2276_v42, %v6041_v34 }
 0x4d9   : > { %v4902_v8 = vpop.permute.xlu1 %1985  ;;  %v2246_v30 = vcombine.high %v4645_v36, %v4670_v24  ;;  %v2015_v36 = vcombine.low %v4757_v57, %v4785_v29  ;;  %v2016_v24 = vcombine.high %v4757_v57, %v4785_v29  ;;  %v1579_v29 = vcombine.low %v4657_v40, %v4643_v23 }
 0x4da   : > { %v2068_v9 = vcombine.high %v4874_v28, %v4902_v8  ;;  %v3570_v44 = vpack.i.bf16 %v2728_v20, %v2276_v42  ;;  %6042 = vst [vmem:[#allocation50_spill] sm:$0xff] %v4922_v38  ;;  %v4925_v5 = vcombine.high %v2728_v20, %v6041_v34  ;;  %v4928_v28 = vrot.slane %v2528_v50, %v4294_v16 }
 0x4db   : > { %v4910_v4 = vpop.permute.xlu0 %2671  ;;  %v4933_v47 = vrot.slane %v2491_v6, %v4300_v1  ;;  %v4940_v33 = vrot.slane %v2476_v37, %v4300_v1  ;;  %v6044_v42 = vcombine.low %v4634_v55, %v4631_v32  ;;  %v2696_v37 = vrot.slane %v2682_v12, %v4294_v16 }
 0x4dc   : > { %3571 = vrot.lane.b32.xlu1 %v3570_v44, %s4011_s29  ;;  %6043 = vst [vmem:[#allocation51_spill] sm:$0xff] %v4925_v5  ;;  %v2698_v44 = vcombine.high %v4698_v21, %v4728_v11  ;;  %v2230_v21 = vcombine.high %v4800_v7, %v4827_v58  ;;  %v2559_v11 = vcombine.low %v4918_v35, %v4928_v28 }
 0x4dd   : > { %v1976_v3 = vpop.permute.xlu1 %1975  ;;  %v4958_v6 = vrot.slane %v6044_v42, %v4300_v1  ;;  %v2765_v31 = vcombine.low %v4886_v14, %v4910_v4  ;;  %v2560_v57 = vcombine.high %v4918_v35, %v4928_v28  ;;  %v2260_v7 = vrot.slane %v2246_v30, %v4294_v16 }
 0x4de   : > { %v2297_v58 = vcombine.low %v4687_v53, %v4715_v17  ;;  %v2313_v32 = vcombine.low %v4855_v22, %v4864_v10  ;;  %v2712_v55 = vrot.slane %v2698_v44, %v4294_v16  ;;  %v2749_v12 = vcombine.low %v4743_v13, %v4772_v51 }
 0x4df   : > { %v4937_v26 = vpop.permute.xlu0 %1981  ;;  %6045 = vst [vmem:[#allocation52_spill] sm:$0xff] %v4958_v6  ;;  %v4978_v28 = vrot.slane %v2015_v36, %v4294_v16  ;;  %v2030_v40 = vrot.slane %v2016_v24, %v4294_v16  ;;  %v2244_v23 = vrot.slane %v2230_v21, %v4294_v16  ;;  %v4985_v44 = vrot.slane %v2765_v31, %v4294_v16 }
 0x4e0   : > { %v2729_v35 = vcombine.low %v2696_v37, %v2712_v55  ;;  %v2730_v36 = vcombine.high %v2696_v37, %v2712_v55  ;;  %v4994_v53 = vrot.slane %v2313_v32, %v4294_v16  ;;  %v2082_v24 = vrot.slane %v2068_v9, %v4294_v16 }
 0x4e1   : > { %v1984_v50 = vpop.permute.xlu1 %1983  ;;  %v4999_v17 = vrot.slane %v2297_v58, %v4294_v16  ;;  %v5002_v31 = vrot.slane %v2749_v12, %v4294_v16  ;;  %v2277_v22 = vcombine.low %v2244_v23, %v2260_v7  ;;  %v2278_v10 = vcombine.high %v2244_v23, %v2260_v7 }
 0x4e2   : > { %v1999_v42 = vcombine.low %v1976_v3, %v1984_v50  ;;  %v2000_v20 = vcombine.high %v1976_v3, %v1984_v50  ;;  %v5007_v32 = vrot.slane %v2729_v35, %v4300_v1 }
 0x4e3   : > { %v4975_v38 = vpop.permute.xlu0 %1989  ;;  %6047 = vst [vmem:[#allocation54_spill] sm:$0xff] %v4999_v17  ;;  %v2782_v9 = vcombine.high %v5002_v31, %v4985_v44  ;;  %v2330_v7 = vcombine.high %v4999_v17, %v4994_v53  ;;  %v5055_v17 = vrot.slane %v2277_v22, %v4300_v1 }
 0x4e4   : > { %v2084_v30 = vcombine.high %v4937_v26, %v4975_v38  ;;  %v4988_v5 = vrot.slane %v1999_v42, %v4294_v16  ;;  %v2014_v3 = vrot.slane %v2000_v20, %v4294_v16 }
 0x4e5   : > { %v4991_v50 = vpop.permute.xlu1 %2889 }
 0x4e6   : > { %6046 = vst [vmem:[#allocation53_spill] sm:$0xff] %v4988_v5  ;;  %v2098_v21 = vrot.slane %v2084_v30, %v4294_v16  ;;  %v2032_v42 = vcombine.high %v4988_v5, %v4978_v28  ;;  %v2047_v20 = vcombine.low %v2014_v3, %v2030_v40  ;;  %v5020_v5 = vrot.slane %v2730_v36, %v4300_v1 }
 0x4e7   : > { %v2048_v23 = vcombine.high %v2014_v3, %v2030_v40  ;;  %v6048_v40 = vcombine.low %v4535_v25, %v4541_v27  ;;  %v5063_v27 = vrot.slane %v2560_v57, %v4300_v1 }
 0x4e8   : > { %v2115_v37 = vcombine.low %v2082_v24, %v2098_v21  ;;  %v2116_v55 = vcombine.high %v2082_v24, %v2098_v21  ;;  %v5012_v58 = vrot.slane %v2032_v42, %v4300_v1  ;;  %v5015_v12 = vrot.slane %v2047_v20, %v4300_v1 }
 0x4e9   : > { %v5017_v30 = vpop.permute.xlu1 %2897  ;;  %v5037_v20 = vrot.slane %v2278_v10, %v4300_v1  ;;  %v5043_v3 = vrot.slane %v6048_v40, %v4300_v1  ;;  %v5052_v21 = vrot.slane %v2559_v11, %v4300_v1  ;;  %v5058_v10 = vrot.slane %v2782_v9, %v4300_v1 }
 0x4ea   : > { %v5025_v35 = vrot.slane %v2115_v37, %v4300_v1  ;;  %v5028_v24 = vrot.slane %v2116_v55, %v4300_v1  ;;  %v3595_v42 = vpack.i.bf16 %v4933_v47, %v5015_v12  ;;  %v3585_v36 = vpack.i.bf16 %v4940_v33, %v5012_v58 }
 0x4eb   : > { %6049 = vst [vmem:[#allocation55_spill] sm:$0xff] %v5043_v3  ;;  %v6050_v37 = vcombine.low %v4438_v41, %v4444_v43  ;;  %v5066_v41 = vrot.slane %v1579_v29, %v4300_v1  ;;  %v2344_v43 = vrot.slane %v2330_v7, %v4300_v1  ;;  %v3600_v22 = vpack.i.bf16 %v5020_v5, %v5037_v20 }
 0x4ec   : > { %3596 = vrot.lane.b32.xlu1 %v3595_v42, %s4009_s14  ;;  %3586 = vrot.lane.b32.xlu0 %v3585_v36, %s4011_s29  ;;  %v1449_v11 = vcombine.high %v4958_v6, %v6041_v34  ;;  %v5074_v9 = vrot.slane %v2048_v23, %v4300_v1  ;;  %v3590_v42 = vpack.i.bf16 %v5007_v32, %v5055_v17 }
 0x4ed   : > { %v5049_v55 = vrot.slane %v6050_v37, %v4300_v1  ;;  %v2888_v25 = vpop.permute.xlu1 %2887  ;;  %6052 = vst [vmem:[#allocation57_spill] sm:$0xff] %v5066_v41  ;;  %v2927_v7 = vcombine.low %v4813_v0, %v4836_v46  ;;  %v2928_v36 = vcombine.high %v4813_v0, %v4836_v46  ;;  %v1893_v40 = vcombine.high %v5043_v3, %v6041_v34 }
 0x4ee   : > { %v6053_v37 = vcombine.high %v4877_v52, %v4892_v45  ;;  %v5098_v29 = vcombine.high %v5058_v10, %v6041_v34  ;;  %v1611_v3 = vcombine.high %v5066_v41, %v6041_v34  ;;  %v5107_v52 = vcombine.high %v2344_v43, %v6041_v34 }
 0x4ef   : > { %6051 = vst [vmem:[#allocation56_spill] sm:$0xff] %v5049_v55  ;;  %v1137_v46 = vcombine.high %v5049_v55, %v6041_v34  ;;  %v5110_v45 = vrot.slane %v2927_v7, %v4294_v16  ;;  %v5129_v7 = vcombine.high %v5063_v27, %v6041_v34  ;;  %v1382_v55 = vcombine.high %v4660_v56, %v6041_v34 }
 0x4f0   : > { %3601 = vrot.lane.b32.xlu1 %v3600_v22, %s4005_s11  ;;  %3591 = vrot.lane.b32.xlu0 %v3590_v42, %s4009_s14  ;;  %v5094_v57 = vrot.slane %v6053_v37, %v4300_v1  ;;  %v3610_v22 = vpack.i.bf16 %v1893_v40, %v1449_v11  ;;  %6054 = vst [vmem:[#allocation58_spill] sm:$0xff] %v5107_v52 }
 0x4f1   : > { %v2896_v23 = vpop.permute.xlu1 %2895  ;;  %v5113_v37 = vrot.slane %v2928_v36, %v4294_v16  ;;  %v6055_v41 = vcombine.low %v4623_v60, %v4626_v2  ;;  %v1826_v56 = vcombine.high %v4676_v15, %v6041_v34  ;;  %v6057_v60 = vcombine.low %v4485_v63, %v4482_v62  ;;  %v6060_v63 = vld [vmem:[#allocation17_spill] sm:$0xff]  ;;  %v6067_v36 = vld [vmem:[#allocation18_spill] sm:$0xff] }
 0x4f2   : > { %v2911_v6 = vcombine.low %v2888_v25, %v2896_v23  ;;  %v2912_v0 = vcombine.high %v2888_v25, %v2896_v23  ;;  %v3605_v42 = vpack.i.bf16 %v5094_v57, %v5074_v9  ;;  %v5125_v23 = vcombine.high %v5028_v24, %v6041_v34 }
 0x4f3   : > { %v5173_v2 = vrot.slane %v6057_v60, %v4300_v1 }
 0x4f4   : > { %v5116_v25 = vrot.slane %v2911_v6, %v4294_v16  ;;  %v5119_v11 = vrot.slane %v2912_v0, %v4294_v16  ;;  %3611 = vrot.lane.b32.xlu1 %v3610_v22, %s4010_s9  ;;  %3606 = vrot.lane.b32.xlu0 %v3605_v42, %s4005_s11  ;;  %v5141_v22 = vcombine.high %v5052_v21, %v6041_v34 }
 0x4f5   : > { %v3630_v42 = vpack.i.bf16 %v1611_v3, %v1137_v46  ;;  %v5149_v6 = vcombine.high %v5025_v35, %v6041_v34  ;;  %v5155_v0 = vrot.slane %v6055_v41, %v4300_v1  ;;  %v3635_v41 = vpack.i.bf16 %v1826_v56, %v1382_v55 }
 0x4f6   : > { %v2944_v40 = vcombine.high %v5116_v25, %v5110_v45  ;;  %v2959_v52 = vcombine.low %v5119_v11, %v5113_v37  ;;  %v1825_v62 = vcombine.high %v5173_v2, %v6041_v34  ;;  %v3665_v55 = vpack.i.bf16 %v5058_v10, %v2344_v43 }
 0x4f7   : > { %6056 = vst [vmem:[#allocation59_spill] sm:$0xff] %v5155_v0  ;;  %v1381_v46 = vcombine.high %v5155_v0, %v6041_v34  ;;  %v2083_v10 = vcombine.low %v4937_v26, %v4975_v38  ;;  %v6068_v38 = vld [vmem:[#allocation21_spill] sm:$0xff]  ;;  %v2766_v26 = vcombine.high %v4886_v14, %v4910_v4  ;;  %v2750_v4 = vcombine.high %v4743_v13, %v4772_v51  ;;  %v6072_v14 = vld [vmem:[#allocation44_spill] sm:$0xff]  ;;  %v6076_v13 = vld [vmem:[#allocation34_spill] sm:$0xff] }
 0x4f8   : > { %v5160_v3 = vrot.slane %v2944_v40, %v4300_v1  ;;  %3631 = vrot.lane.b32.xlu1 %v3630_v42, %s4010_s9  ;;  %v6058_v40 = vcombine.low %v4683_v49, %v4680_v54  ;;  %v5182_v15 = vrot.slane %v2959_v52, %v4300_v1  ;;  %v6061_v54 = vcombine.low %v4479_v61, %v6060_v63  ;;  %v6064_v63 = vld [vmem:[#allocation47_spill] sm:$0xff]  ;;  %v6091_v0 = vld [vmem:[#allocation41_spill] sm:$0xff] }
 0x4f9   : > { %v1681_v52 = vcombine.high %v4762_v59, %v6041_v34  ;;  %v3615_v56 = vpack.i.bf16 %v1825_v62, %v1381_v46  ;;  %v1452_v59 = vcombine.high %v4790_v48, %v6041_v34  ;;  %v1894_v48 = vcombine.high %v6068_v38, %v6041_v34  ;;  %v6078_v38 = vld [vmem:[#allocation22_spill] sm:$0xff] }
 0x4fa   : > { %3052 = vrot.lane.b32.xlu0 %v5160_v3, %s4011_s29  ;;  %v5179_v42 = vrot.slane %v6058_v40, %v4300_v1  ;;  %v5195_v49 = vrot.slane %v6061_v54, %v4300_v1  ;;  %v6063_v40 = vld [vmem:[#allocation20_spill] sm:$0xff]  ;;  %v2067_v54 = vcombine.low %v6064_v63, %v4902_v8  ;;  %v1384_v51 = vcombine.high %v6076_v13, %v6041_v34  ;;  %v6082_v13 = vld [vmem:[#allocation23_spill] sm:$0xff] }
 0x4fb   : > { %v1450_v62 = vcombine.high %v6063_v40, %v6041_v34 }
 0x4fc   : > { %6059 = vst [vmem:[#allocation60_spill] sm:$0xff] %v5179_v42  ;;  %3636 = vrot.lane.b32.xlu1 %v3635_v41, %s4008_s23  ;;  %6062 = vst [vmem:[#allocation17_spill] sm:$0xff] %v5195_v49  ;;  %v1679_v60 = vcombine.high %v5179_v42, %v6041_v34  ;;  %v1207_v41 = vcombine.high %v4778_v39, %v6041_v34  ;;  %v1205_v61 = vcombine.high %v5195_v49, %v6041_v34  ;;  %v6065_v39 = vld [vmem:[#allocation36_spill] sm:$0xff] }
 0x4fe   : > { %3060 = vrot.lane.b32.xlu0 %v5182_v15, %s4009_s14  ;;  %v3670_v43 = vpack.i.bf16 %v1681_v52, %v1207_v41  ;;  %v3620_v46 = vpack.i.bf16 %v1679_v60, %v1205_v61  ;;  %v5227_v52 = vrot.slane %v2083_v10, %v4294_v16  ;;  %v6069_v60 = vld [vmem:[#allocation32_spill] sm:$0xff]  ;;  %v6070_v61 = vcombine.low %v4517_v18, %v4519_v19  ;;  %v6073_v10 = vld [vmem:[#allocation43_spill] sm:$0xff] }
 0x4ff   : > { %v1613_v41 = vcombine.high %v6069_v60, %v6041_v34  ;;  %v2314_v63 = vcombine.high %v6073_v10, %v6072_v14  ;;  %v6080_v10 = vld [vmem:[#allocation35_spill] sm:$0xff] }
 0x500   : > { %3666 = vrot.lane.b32.xlu1 %v3665_v55, %s4011_s29  ;;  %v1896_v55 = vcombine.high %v6065_v39, %v6041_v34  ;;  %v6074_v39 = vld [vmem:[#allocation33_spill] sm:$0xff] }
 0x501   : > { %v1139_v18 = vcombine.high %v6074_v39, %v6041_v34  ;;  %v5270_v14 = vrot.slane %v2314_v63, %v4294_v16 }
 0x502   : > { %3616 = vrot.lane.b32.xlu0 %v3615_v56, %s4010_s9  ;;  %v6066_v56 = vld [vmem:[#allocation19_spill] sm:$0xff]  ;;  %v3675_v8 = vpack.i.bf16 %v1896_v55, %v1452_v59  ;;  %v5244_v59 = vrot.slane %v2067_v54, %v4294_v16 }
 0x503   : > { %v2527_v49 = vcombine.low %v6067_v36, %v6066_v56  ;;  %v5235_v36 = vrot.slane %v6070_v61, %v4294_v16  ;;  %v6077_v56 = vld [vmem:[#allocation26_spill] sm:$0xff]  ;;  %v3680_v60 = vpack.i.bf16 %v1613_v41, %v1139_v18  ;;  %v6079_v61 = vld [vmem:[#allocation28_spill] sm:$0xff] }
 0x504   : > { %3671 = vrot.lane.b32.xlu1 %v3670_v43, %s4007_s12  ;;  %v3625_v43 = vpack.i.bf16 %v1894_v48, %v1450_v62  ;;  %v6075_v62 = vld [vmem:[#allocation24_spill] sm:$0xff]  ;;  %v2298_v54 = vcombine.high %v6078_v38, %v6077_v56  ;;  %v5260_v48 = vrot.slane %v2766_v26, %v4294_v16  ;;  %v1828_v26 = vcombine.high %v6080_v10, %v6041_v34  ;;  %v6081_v41 = vld [vmem:[#allocation30_spill] sm:$0xff] }
 0x505   : > { %v5250_v19 = vrot.slane %v2527_v49, %v4294_v16  ;;  %v1206_v55 = vcombine.high %v6075_v62, %v6041_v34  ;;  %v1612_v56 = vcombine.high %v6082_v13, %v6041_v34 }
 0x506   : > { %3621 = vrot.lane.b32.xlu0 %v3620_v46, %s4010_s9  ;;  %v6071_v46 = vld [vmem:[#allocation25_spill] sm:$0xff]  ;;  %v5281_v18 = vrot.slane %v2298_v54, %v4294_v16  ;;  %v3685_v62 = vpack.i.bf16 %v1828_v26, %v1384_v51  ;;  %v6083_v54 = vld [vmem:[#allocation27_spill] sm:$0xff] }
 0x507   : > { %v1680_v40 = vcombine.high %v6071_v46, %v6041_v34  ;;  %v5267_v46 = vrot.slane %v2750_v4, %v4294_v16  ;;  %v2544_v39 = vcombine.high %v5235_v36, %v5250_v19 }
 0x508   : > { %3676 = vrot.lane.b32.xlu1 %v3675_v8, %s4006_s15  ;;  %v2100_v8 = vcombine.high %v5244_v59, %v5227_v52  ;;  %v2345_v38 = vcombine.low %v5281_v18, %v5270_v14 }
 0x509   : > { %v3640_v49 = vpack.i.bf16 %v1680_v40, %v1206_v55  ;;  %v1895_v40 = vcombine.high %v6081_v41, %v6041_v34  ;;  %v2797_v4 = vcombine.low %v5267_v46, %v5260_v48 }
 0x50a   : > { %3626 = vrot.lane.b32.xlu0 %v3625_v43, %s4008_s23  ;;  %v1451_v43 = vcombine.high %v6079_v61, %v6041_v34  ;;  %v5286_v63 = vrot.slane %v2100_v8, %v4300_v1  ;;  %v6084_v61 = vld [vmem:[#allocation46_spill] sm:$0xff]  ;;  %v5315_v13 = vrot.slane %v2345_v38, %v4300_v1 }
 0x50b   : > { %v5300_v8 = vrot.slane %v2797_v4, %v4300_v1  ;;  %v6089_v4 = vld [vmem:[#allocation49_spill] sm:$0xff] }
 0x50c   : > { %3681 = vrot.lane.b32.xlu1 %v3680_v60, %s4007_s12  ;;  %v3645_v55 = vpack.i.bf16 %v1895_v40, %v1451_v43  ;;  %v5294_v60 = vrot.slane %v2544_v39, %v4300_v1  ;;  %v6085_v43 = vld [vmem:[#allocation45_spill] sm:$0xff] }
 0x50d   : > { %v6086_v10 = vcombine.low %v6084_v61, %v6085_v43  ;;  %v6087_v39 = vld [vmem:[#allocation53_spill] sm:$0xff]  ;;  %v6092_v61 = vld [vmem:[#allocation40_spill] sm:$0xff]  ;;  %v3705_v38 = vpack.i.bf16 %v5300_v8, %v5315_v13 }
 0x50e   : > { %3641 = vrot.lane.b32.xlu0 %v3640_v49, %s4008_s23  ;;  %v1138_v49 = vcombine.high %v6083_v54, %v6041_v34  ;;  %v3695_v51 = vpack.i.bf16 %v5294_v60, %v5286_v63  ;;  %v2031_v41 = vcombine.low %v6087_v39, %v4978_v28  ;;  %v6090_v54 = vld [vmem:[#allocation48_spill] sm:$0xff]  ;;  %v6093_v43 = vcombine.low %v6091_v0, %v6092_v61  ;;  %v6094_v28 = vld [vmem:[#allocation31_spill] sm:$0xff] }
 0x50f   : > { %v5308_v26 = vrot.slane %v6086_v10, %v4300_v1  ;;  %v2475_v42 = vcombine.low %v6090_v54, %v6089_v4  ;;  %v2894_v54 = vpop.permute.xlu0 %2893 }
 0x510   : > { %3686 = vrot.lane.b32.xlu1 %v3685_v62, %s4006_s15  ;;  %v3650_v40 = vpack.i.bf16 %v1612_v56, %v1138_v49  ;;  %v6088_v62 = vld [vmem:[#allocation29_spill] sm:$0xff]  ;;  %v5324_v10 = vrot.slane %v6093_v43, %v4300_v1  ;;  %v1827_v56 = vcombine.high %v6094_v28, %v6041_v34  ;;  %v5334_v39 = vrot.slane %v2031_v41, %v4300_v1 }
 0x511   : > { %v6095_v49 = vld [vmem:[#allocation37_spill] sm:$0xff]  ;;  %v2745_v0 = vcombine.high %v5308_v26, %v6041_v34  ;;  %v5345_v43 = vrot.slane %v2475_v42, %v4300_v1 }
 0x512   : > { %3646 = vrot.lane.b32.xlu0 %v3645_v55, %s4007_s12  ;;  %v1383_v55 = vcombine.high %v6088_v62, %v6041_v34  ;;  %v2293_v61 = vcombine.high %v5324_v10, %v6041_v34 }
 0x514   : > { %3696 = vrot.lane.b32.xlu1 %v3695_v51, %s4011_s29  ;;  %v1682_v51 = vcombine.high %v6095_v49, %v6041_v34  ;;  %v3655_v62 = vpack.i.bf16 %v1827_v56, %v1383_v55  ;;  %v2064_v55 = vcombine.high %v5012_v58, %v6041_v34  ;;  %v3660_v28 = vpack.i.bf16 %v2745_v0, %v2293_v61  ;;  %v6097_v61 = vld [vmem:[#allocation39_spill] sm:$0xff] }
 0x515   : > { %v2063_v56 = vcombine.high %v5334_v39, %v6041_v34  ;;  %v2507_v49 = vcombine.high %v5345_v43, %v6041_v34  ;;  %v2295_v0 = vcombine.high %v5055_v17, %v6041_v34  ;;  %v6098_v17 = vld [vmem:[#allocation51_spill] sm:$0xff] }
 0x516   : > { %3651 = vrot.lane.b32.xlu0 %v3650_v40, %s4008_s23  ;;  %v6096_v40 = vld [vmem:[#allocation38_spill] sm:$0xff] }
 0x517   : > { %v1208_v4 = vcombine.high %v6096_v40, %v6041_v34  ;;  %v3690_v58 = vpack.i.bf16 %v2507_v49, %v2063_v56 }
 0x518   : > { %3706 = vrot.lane.b32.xlu1 %v3705_v38, %s4009_s14  ;;  %v2508_v38 = vcombine.high %v4940_v33, %v6041_v34 }
 0x519   : > { %v3710_v41 = vpack.i.bf16 %v1682_v51, %v1208_v4  ;;  %v2747_v51 = vcombine.high %v5007_v32, %v6041_v34  ;;  %v2065_v4 = vcombine.high %v5015_v12, %v6041_v34  ;;  %v2979_v32 = vcombine.low %v4991_v50, %v5017_v30 }
 0x51a   : > { %3656 = vrot.lane.b32.xlu0 %v3655_v62, %s4007_s12  ;;  %v3720_v42 = vpack.i.bf16 %v2508_v38, %v2064_v55  ;;  %v2902_v62 = vpop.permute.xlu0 %2901  ;;  %v2509_v55 = vcombine.high %v4933_v47, %v6041_v34  ;;  %v6101_v38 = vld [vmem:[#allocation42_spill] sm:$0xff] }
 0x51b   : > { %v2995_v40 = vcombine.low %v2894_v54, %v2902_v62  ;;  %v3730_v33 = vpack.i.bf16 %v2747_v51, %v2295_v0  ;;  %v1140_v49 = vcombine.high %v6101_v38, %v6041_v34  ;;  %v2996_v12 = vcombine.high %v2894_v54, %v2902_v62 }
 0x51c   : > { %3711 = vrot.lane.b32.xlu1 %v3710_v41, %s4006_s15  ;;  %v1614_v41 = vcombine.high %v6097_v61, %v6041_v34  ;;  %v3740_v51 = vpack.i.bf16 %v2509_v55, %v2065_v4  ;;  %v2798_v0 = vcombine.high %v5267_v46, %v5260_v48  ;;  %v2296_v61 = vcombine.high %v5037_v20, %v6041_v34  ;;  %v6102_v4 = vld [vmem:[#allocation54_spill] sm:$0xff] }
 0x51d   : > { %v2346_v54 = vcombine.high %v5281_v18, %v5270_v14  ;;  %v3010_v62 = vrot.slane %v2996_v12, %v4294_v16  ;;  %v6103_v20 = vcombine.high %v4991_v50, %v5017_v30  ;;  %v2066_v30 = vcombine.high %v5074_v9, %v6041_v34 }
 0x51e   : > { %3661 = vrot.lane.b32.xlu0 %v3660_v28, %s4010_s9  ;;  %v6099_v28 = vld [vmem:[#allocation50_spill] sm:$0xff]  ;;  %v3715_v47 = vpack.i.bf16 %v1614_v41, %v1140_v49  ;;  %v2329_v41 = vcombine.low %v6102_v4, %v4994_v53  ;;  %v2132_v38 = vcombine.high %v5286_v63, %v6041_v34  ;;  %v2099_v9 = vcombine.low %v5244_v59, %v5227_v52 }
 0x51f   : > { %v6100_v56 = vpack.i.bf16 %v6098_v17, %v6099_v28  ;;  %v2994_v14 = vrot.slane %v6103_v20, %v4294_v16  ;;  %v2510_v28 = vcombine.high %v5094_v57, %v6041_v34  ;;  %v6106_v49 = vcombine.low %v5116_v25, %v5110_v45 }
 0x520   : > { %3721 = vrot.lane.b32.xlu1 %v3720_v42, %s4008_s23  ;;  %v5379_v42 = vrot.slane %v2995_v40, %v4294_v16  ;;  %v2812_v40 = vrot.slane %v2798_v0, %v4300_v1  ;;  %v5417_v17 = vrot.slane %v2329_v41, %v4300_v1  ;;  %v2815_v52 = vcombine.high %v5300_v8, %v6041_v34 }
 0x521   : > { %v5443_v12 = vrot.slane %v6106_v49, %v4300_v1  ;;  %v5456_v45 = vrot.slane %v2099_v9, %v4300_v1  ;;  %v2363_v63 = vcombine.high %v5315_v13, %v6041_v34  ;;  %v2976_v0 = vcombine.high %v5160_v3, %v6041_v34 }
 0x522   : > { %3691 = vrot.lane.b32.xlu0 %v3690_v58, %s4010_s9  ;;  %v2748_v58 = vcombine.high %v5020_v5, %v6041_v34  ;;  %v2781_v5 = vcombine.low %v5002_v31, %v4985_v44  ;;  %v2360_v44 = vrot.slane %v2346_v54, %v4300_v1  ;;  %v6104_v31 = vpack.i.bf16 %v5052_v21, %v5025_v35 }
 0x523   : > { %v2361_v35 = vcombine.high %v5417_v17, %v6041_v34  ;;  %v6105_v21 = vpack.i.bf16 %v5063_v27, %v5028_v24  ;;  %v2576_v24 = vcombine.high %v5294_v60, %v6041_v34  ;;  %v2543_v27 = vcombine.low %v5235_v36, %v5250_v19 }
 0x524   : > { %3731 = vrot.lane.b32.xlu1 %v3730_v33, %s4007_s12  ;;  %v5386_v33 = vrot.slane %v2979_v32, %v4294_v16  ;;  %v3750_v46 = vpack.i.bf16 %v2748_v58, %v2296_v61  ;;  %v5413_v18 = vrot.slane %v2781_v5, %v4300_v1  ;;  %v3027_v32 = vcombine.low %v2994_v14, %v3010_v62 }
 0x525   : > { %v3735_v55 = vpack.i.bf16 %v2812_v40, %v2360_v44  ;;  %v3775_v57 = vpack.i.bf16 %v2576_v24, %v2132_v38  ;;  %v2975_v25 = vcombine.high %v5443_v12, %v6041_v34  ;;  %v5467_v36 = vrot.slane %v2543_v27, %v4300_v1 }
 0x526   : > { %3701 = vrot.lane.b32.xlu0 %v6100_v56, %s4008_s23  ;;  %v3012_v48 = vcombine.high %v5386_v33, %v5379_v42  ;;  %v3035_v16 = vrot.slane %v3027_v32, %v4300_v1  ;;  %v2813_v50 = vcombine.high %v5413_v18, %v6041_v34  ;;  %v5445_v58 = vpop.permute.xlu1 %3521  ;;  %v3028_v19 = vcombine.high %v2994_v14, %v3010_v62 }
 0x527   : > { %v3780_v8 = vpack.i.bf16 %v2815_v52, %v2363_v63  ;;  %v2575_v13 = vcombine.high %v5467_v36, %v6041_v34  ;;  %v3011_v61 = vcombine.low %v5386_v33, %v5379_v42  ;;  %v6107_v42 = vpack.i.bf16 %v5129_v7, %v5125_v23  ;;  %v6108_v33 = vld [vmem:[#allocation58_spill] sm:$0xff] }
 0x528   : > { %3741 = vrot.lane.b32.xlu1 %v3740_v51, %s4007_s12  ;;  %v3026_v53 = vrot.slane %v3012_v48, %v4300_v1  ;;  %v3760_v56 = vpack.i.bf16 %v2813_v50, %v2361_v35  ;;  %v3755_v51 = vpack.i.bf16 %v2510_v28, %v2066_v30  ;;  %v3042_v5 = vrot.slane %v3028_v19, %v4300_v1 }
 0x529   : > { %v5489_v3 = vrot.slane %v3011_v61, %v4300_v1  ;;  %v6109_v4 = vpack.i.bf16 %v5098_v29, %v6108_v33  ;;  %v2816_v14 = vcombine.high %v2812_v40, %v6041_v34  ;;  %v2364_v23 = vcombine.high %v2360_v44, %v6041_v34 }
 0x52a   : > { %3716 = vrot.lane.b32.xlu0 %v3715_v47, %s4006_s15  ;;  %v5469_v60 = vpop.permute.xlu1 %3526  ;;  %v2131_v47 = vcombine.high %v5456_v45, %v6041_v34  ;;  %v3044_v29 = vcombine.high %v3026_v53, %v6041_v34  ;;  %v3045_v40 = vcombine.high %v3035_v16, %v6041_v34  ;;  %v2977_v50 = vcombine.high %v5182_v15, %v6041_v34  ;;  %v3150_v15 = vld [vmem:[%s5925_s6] sm:$0xf] }
 0x52b   : > { %v3043_v20 = vcombine.high %v5489_v3, %v6041_v34  ;;  %v3790_v32 = vpack.i.bf16 %v2816_v14, %v2364_v23  ;;  %v3529_v63 = vunpack.i.h.bf16 %v5469_v60  ;;  %v3528_v19 = vunpack.i.l.bf16 %v5469_v60 }
 0x52c   : > { %3751 = vrot.lane.b32.xlu1 %v3750_v46, %s4006_s15  ;;  %v3765_v62 = vpack.i.bf16 %v2575_v13, %v2131_v47  ;;  %v6112_v13 = vld [vmem:[#allocation59_spill] sm:$0xff] }
 0x52e   : > { %3726 = vrot.lane.b32.xlu0 %v6104_v31, %s4009_s14  ;;  %v5460_v59 = vpop.permute.xlu0 %3531  ;;  %v5484_v48 = vpop.permute.xlu1 %3541  ;;  %v6110_v31 = vpack.i.bf16 %v5141_v22, %v5149_v6  ;;  %v4018_v6 = vmov 0  }
 0x52f   : > { %3800 = vset.pattern.permute.xlu1 %v4018_v6  ;;  %3801 = vset.pattern.permute.xlu0 %v4018_v6  ;;  %v3534_v23 = vunpack.i.h.bf16 %v5460_v59 }
 0x530   : > { %3080 = vrot.lane.b32.xlu1 %v3026_v53, %s4011_s29  ;;  %v3046_v53 = vcombine.high %v3042_v5, %v6041_v34 }
 0x532   : > { %3736 = vrot.lane.b32.xlu0 %v3735_v55, %s4005_s11  ;;  %v5481_v54 = vpop.permute.xlu0 %3536  ;;  %v5501_v41 = vpop.permute.xlu1 %3546 }
 0x534   : > { %3088 = vrot.lane.b32.xlu1 %v3035_v16, %s4009_s14  ;;  %v6111_v16 = vcombine.high %v5119_v11, %v5113_v37  ;;  %s5875_s14 = scalar_lea.hbm %s5926_s7, %s3415_s30 }
 0x536   : > { %3746 = vrot.lane.b32.xlu0 %v6105_v21, %s4005_s11  ;;  %v5491_v46 = vpop.permute.xlu0 %3561  ;;  %v5515_v55 = vpop.permute.xlu1 %3551  ;;  %v2974_v30 = vrot.slane %v6111_v16, %v4300_v1  ;;  %v3543_v16 = vunpack.i.l.bf16 %v5484_v48 }
 0x538   : > { %3761 = vrot.lane.b32.xlu1 %v3760_v56, %s4010_s9  ;;  %v2978_v28 = vcombine.high %v2974_v30, %v6041_v34 }
 0x53a   : > { %3756 = vrot.lane.b32.xlu0 %v3755_v51, %s4006_s15  ;;  %v5512_v7 = vpop.permute.xlu0 %3566  ;;  %v5526_v44 = vpop.permute.xlu1 %3556 }
 0x53c   : > { %3776 = vrot.lane.b32.xlu1 %v3775_v57, %s4008_s23 }
 0x53e   : > { %3048 = vrot.lane.b32.xlu0 %v2975_v25, %s4010_s9  ;;  %v5522_v22 = vpop.permute.xlu0 %3576 }
 0x540   : > { %3781 = vrot.lane.b32.xlu1 %v3780_v8, %s4007_s12 }
 0x542   : > { %3056 = vrot.lane.b32.xlu0 %v2976_v0, %s4008_s23  ;;  %v5538_v35 = vpop.permute.xlu0 %3581 }
 0x544   : > { %3096 = vrot.lane.b32.xlu1 %v3042_v5, %s4005_s11 }
 0x546   : > { %3766 = vrot.lane.b32.xlu0 %v3765_v62, %s4010_s9  ;;  %v3549_v62 = vunpack.i.h.bf16 %v5501_v41 }
 0x548   : > { %3796 = vrot.lane.b32.xlu1 %v6107_v42, %s4006_s15  ;;  %v3548_v42 = vunpack.i.l.bf16 %v5501_v41 }
 0x54a   : > { %3771 = vrot.lane.b32.xlu0 %v6109_v4, %s4008_s23 }
 0x54c   : > { %3076 = vrot.lane.b32.xlu1 %v3043_v20, %s4010_s9  ;;  %v3524_v20 = vunpack.i.h.bf16 %v5445_v58  ;;  %s3243_s9 = scalar_lea.sflag [#allocation5], %s4225_s13 }
 0x54e   : > { %3786 = vrot.lane.b32.xlu0 %v6110_v31, %s4007_s12  ;;  %v5540_v21 = vpop.permute.xlu1 %3571  ;;  %v3523_v31 = vunpack.i.l.bf16 %v5445_v58  ;;  %v3539_v58 = vunpack.i.h.bf16 %v5481_v54 }
 0x550   : > { %3084 = vrot.lane.b32.xlu1 %v3044_v29, %s4008_s23 }
 0x552   : > { %3791 = vrot.lane.b32.xlu0 %v3790_v32, %s4006_s15  ;;  %v3544_v32 = vunpack.i.h.bf16 %v5484_v48 }
 0x554   : > { %3092 = vrot.lane.b32.xlu1 %v3045_v40, %s4007_s12  ;;  %v3533_v40 = vunpack.i.l.bf16 %v5460_v59 }
 0x556   : > { %3064 = vrot.lane.b32.xlu0 %v2977_v50, %s4007_s12 }
 0x558   : > { %3100 = vrot.lane.b32.xlu1 %v3046_v53, %s4006_s15 }
 0x55a   : > { %3068 = vrot.lane.b32.xlu0 %v2974_v30, %s4005_s11  ;;  %v3538_v30 = vunpack.i.l.bf16 %v5481_v54  ;;  %v6113_v54 = vld [vmem:[#allocation55_spill] sm:$0xff]  ;;  %s372_s11 = scalar_lea.vmem [#allocation9], %s4228_s18  ;;  %s3926_s18 = sshll.u32 %s4019_s28, 4  ;;  %s3927_s18 = int_to_ptr.vmem [resolvable:$false] %s3926_s18 }
 0x55b   : > { %s3928_s17 = scalar_lea.vmem %s3927_s18, 256 }
 0x55c   : > { %3153 = vperm.xlu1 %3800, %v3150_v15  }
 0x55e   : > { %3072 = vrot.lane.b32.xlu0 %v2978_v28, %s4006_s15  ;;  %v5544_v56 = vpop.permute.xlu1 %3596  ;;  %v5546_v1 = vpop.permute.xlu0 %3586  ;;  %s3257_s15 = sshll.u32 %s372_s11, 4  ;;  %s5877_s15 = int_to_ptr.vmem [resolvable:$true] %s3257_s15 }
 0x55f   : > { %s3922_s29 = scalar_lea.vmem %s5877_s15, 128  ;;  %p3929_p2 = scmp.lt.s32.totalorder %s5877_s15, %s3927_s18 }
 0x560   : > { %p3923_p13 = scmp.ne.s32.totalorder %s5877_s15, %s3922_s29  ;;  %p3930_p5 = scmp.lt.s32.totalorder %s3928_s17, %s3922_s29 }
 0x562   : > { %v5548_v37 = vpop.permute.xlu1 %3601  ;;  %v5550_v11 = vpop.permute.xlu0 %3591  ;;  %p3924_p7 = pnand %p3923_p13, %p6134_p3  ;;  %p3931_p1 = por %p3930_p5, %p3929_p2 }
 0x564   : > { %p3925_p9 = pneg %p3924_p7 }
 0x566   : > { %v3612_v38 = vpop.permute.xlu1 %3611  ;;  %v5552_v9 = vpop.permute.xlu0 %3606  ;;  %p3932_p6 = pnand %p3931_p1, %p3925_p9 }
 0x567   : > { %v3614_v50 = vunpack.i.h.bf16 %v3612_v38  ;;  %v3613_v6 = vunpack.i.l.bf16 %v3612_v38 }
 0x56a   : > { %v5554_v49 = vpop.permute.xlu1 %3631 }
 0x56c   : > { %v5556_v51 = vpop.permute.xlu0 %3052 }
 0x56e   : > { %v3637_v24 = vpop.permute.xlu1 %3636 }
 0x56f   : > { %v3639_v8 = vunpack.i.h.bf16 %v3637_v24  ;;  %v3638_v0 = vunpack.i.l.bf16 %v3637_v24  ;;  %v3554_v24 = vunpack.i.h.bf16 %v5515_v55 }
 0x570   : > { %v5558_v34 = vpop.permute.xlu0 %3060 }
 0x572   : > { %v5560_v27 = vpop.permute.xlu1 %3666 }
 0x574   : > { %v3617_v57 = vpop.permute.xlu0 %3616 }
 0x575   : > { %v3619_v52 = vunpack.i.h.bf16 %v3617_v57  ;;  %v3618_v25 = vunpack.i.l.bf16 %v3617_v57  ;;  %v3553_v57 = vunpack.i.l.bf16 %v5515_v55 }
 0x576   : > { %v5568_v5 = vpop.permute.xlu1 %3671 }
 0x577   : > { %v1953_v47 = vsel %vm1265_vm3, %v5173_v2, %v3619_v52  ;;  %v1509_v61 = vsel %vm1265_vm3, %v6112_v13, %v3618_v25  ;;  %v3558_v25 = vunpack.i.l.bf16 %v5526_v44  ;;  %v6118_v52 = vld [vmem:[#allocation56_spill] sm:$0xff] }
 0x578   : > { %v1954_v33 = vsel %vm1267_vm4, %v1953_v47, %v3529_v63  ;;  %v1510_v60 = vsel %vm1267_vm4, %v1509_v61, %v3528_v19  ;;  %v3622_v4 = vpop.permute.xlu0 %3621  ;;  %v6116_v63 = vld [vmem:[#allocation17_spill] sm:$0xff] }
 0x579   : > { %v1511_v14 = vsel %vm1269_vm5, %v1510_v60, %v3638_v0  ;;  %v1955_v2 = vsel %vm1269_vm5, %v1954_v33, %v3639_v8  ;;  %v1960_v8 = vsel %vm1265_vm3, %v6113_v54, %v3614_v50  ;;  %v6114_v0 = vld [vmem:[#allocation52_spill] sm:$0xff]  ;;  %v3624_v13 = vunpack.i.h.bf16 %v3622_v4 }
 0x57a   : > { %v5580_v29 = vsel %vm540_vm6, %v1511_v14, %v3548_v42  ;;  %v5583_v41 = vsel %vm540_vm6, %v1955_v2, %v3549_v62  ;;  %v5587_v53 = vpop.permute.xlu1 %3676  ;;  %v1516_v47 = vsel %vm1265_vm3, %v6114_v0, %v3613_v6  ;;  %v3623_v61 = vunpack.i.l.bf16 %v3622_v4  ;;  %v6115_v33 = vld [vmem:[#allocation60_spill] sm:$0xff] }
 0x57b   : > { %v3634_v4 = vunpack.i.h.bf16 %v5554_v49  ;;  %v3633_v54 = vunpack.i.l.bf16 %v5554_v49  ;;  %v1517_v0 = vsel %vm1267_vm4, %v1516_v47, %v3523_v31  ;;  %v1961_v42 = vsel %vm1267_vm4, %v1960_v8, %v3524_v20 }
 0x57c   : > { %v3627_v28 = vpop.permute.xlu0 %3626  ;;  %v1278_v19 = vsel %vm1265_vm3, %v6116_v63, %v3623_v61  ;;  %v3588_v47 = vunpack.i.l.bf16 %v5546_v1  ;;  %v6117_v61 = vld [vmem:[#allocation57_spill] sm:$0xff]  ;;  %v3678_v55 = vunpack.i.l.bf16 %v5587_v53 }
 0x57d   : > { %v3629_v60 = vunpack.i.h.bf16 %v3627_v28  ;;  %v3628_v14 = vunpack.i.l.bf16 %v3627_v28  ;;  %v1746_v28 = vsel %vm1265_vm3, %v6115_v33, %v3624_v13  ;;  %v1266_v38 = vsel %vm1265_vm3, %v6118_v52, %v3633_v54 }
 0x57e   : > { %v5605_v62 = vpop.permute.xlu1 %3681  ;;  %v1279_v6 = vsel %vm1267_vm4, %v1278_v19, %v3533_v40  ;;  %v1747_v49 = vsel %vm1267_vm4, %v1746_v28, %v3534_v23  ;;  %v1268_v23 = vsel %vm1267_vm4, %v1266_v38, %v3543_v16 }
 0x57f   : > { %v1962_v31 = vsel %vm1269_vm5, %v1961_v42, %v3629_v60  ;;  %v1518_v20 = vsel %vm1269_vm5, %v1517_v0, %v3628_v14 }
 0x580   : > { %v3642_v2 = vpop.permute.xlu0 %3641  ;;  %v1519_v14 = vsel %vm540_vm6, %v1518_v20, %v3538_v30  ;;  %v1963_v0 = vsel %vm540_vm6, %v1962_v31, %v3539_v58  ;;  %v6121_v20 = vunpack.i.h.bf16 %v5491_v46 }
 0x581   : > { %v3644_v59 = vunpack.i.h.bf16 %v3642_v2  ;;  %v3643_v15 = vunpack.i.l.bf16 %v3642_v2  ;;  %v1739_v2 = vsel %vm1265_vm3, %v6117_v61, %v3634_v4  ;;  %v3594_v4 = vunpack.i.h.bf16 %v5550_v11 }
 0x582   : > { %v5621_v50 = vpop.permute.xlu1 %3686  ;;  %v1740_v30 = vsel %vm1267_vm4, %v1739_v2, %v3544_v32  ;;  %v3684_v61 = vunpack.i.h.bf16 %v5605_v62 }
 0x583   : > { %v1280_v42 = vsel %vm1269_vm5, %v1279_v6, %v3643_v15  ;;  %v1748_v60 = vsel %vm1269_vm5, %v1747_v49, %v3644_v59  ;;  %v3674_v59 = vunpack.i.h.bf16 %v5568_v5  ;;  %v3673_v6 = vunpack.i.l.bf16 %v5568_v5 }
 0x584   : > { %v3647_v8 = vpop.permute.xlu0 %3646  ;;  %v1281_v54 = vsel %vm540_vm6, %v1280_v42, %v3553_v57  ;;  %v1749_v28 = vsel %vm540_vm6, %v1748_v60, %v3554_v24  ;;  %v6119_v5 = vunpack.i.h.bf16 %v5526_v44  ;;  %v3679_v57 = vunpack.i.h.bf16 %v5587_v53 }
 0x585   : > { %v3649_v33 = vunpack.i.h.bf16 %v3647_v8  ;;  %v3648_v63 = vunpack.i.l.bf16 %v3647_v8  ;;  %v3603_v8 = vunpack.i.l.bf16 %v5548_v37  ;;  %v6120_v24 = vunpack.i.l.bf16 %v5491_v46 }
 0x586   : > { %v5639_v13 = vpop.permute.xlu1 %3696  ;;  %v1282_v42 = vsel %vm1272_vm7, %v1281_v54, %v3673_v6  ;;  %v1750_v53 = vsel %vm1272_vm7, %v1749_v28, %v3674_v59  ;;  %v3688_v46 = vunpack.i.l.bf16 %v5621_v50 }
 0x587   : > { %v1520_v52 = vsel %vm1272_vm7, %v1519_v14, %v3648_v63  ;;  %v1964_v40 = vsel %vm1272_vm7, %v1963_v0, %v3649_v33  ;;  %v3689_v0 = vunpack.i.h.bf16 %v5621_v50  ;;  %v6124_v50 = vunpack.i.l.bf16 %v5522_v22 }
 0x588   : > { %v3652_v19 = vpop.permute.xlu0 %3651  ;;  %v1521_v32 = vsel %vm1274_vm8, %v1520_v52, %v3558_v25  ;;  %v1965_v49 = vsel %vm1274_vm8, %v1964_v40, %v6119_v5  ;;  %v3683_v25 = vunpack.i.l.bf16 %v5605_v62 }
 0x589   : > { %v3654_v58 = vunpack.i.h.bf16 %v3652_v19  ;;  %v3653_v15 = vunpack.i.l.bf16 %v3652_v19  ;;  %v1522_v60 = vsel %vm1276_vm9, %v1521_v32, %v3678_v55  ;;  %v1966_v14 = vsel %vm1276_vm9, %v1965_v49, %v3679_v57 }
 0x58a   : > { %v5661_v38 = vpop.permute.xlu1 %3706  ;;  %v6122_v19 = vunpack.i.l.bf16 %v5512_v7  ;;  %v1283_v54 = vsel %vm1274_vm8, %v1282_v42, %v6124_v50  ;;  %v3120_v28 = vrot.slane %v1522_v60, 4 }
 0x58b   : > { %v1741_v16 = vsel %vm1269_vm5, %v1740_v30, %v3654_v58  ;;  %v1270_v48 = vsel %vm1269_vm5, %v1268_v23, %v3653_v15  ;;  %v6123_v30 = vunpack.i.h.bf16 %v5512_v7 }
 0x58c   : > { %v1271_v31 = vsel %vm540_vm6, %v1270_v48, %v6120_v24  ;;  %v1742_v33 = vsel %vm540_vm6, %v1741_v16, %v6121_v20  ;;  %v3657_v63 = vpop.permute.xlu0 %3656  ;;  %v3126_v16 = vrot.slane %v1966_v14, 4 }
 0x58d   : > { %v3659_v44 = vunpack.i.h.bf16 %v3657_v63  ;;  %v3658_v2 = vunpack.i.l.bf16 %v3657_v63  ;;  %v1273_v24 = vsel %vm1272_vm7, %v1271_v31, %v3683_v25  ;;  %v1743_v20 = vsel %vm1272_vm7, %v1742_v33, %v3684_v61 }
 0x58e   : > { %v3712_v40 = vpop.permute.xlu1 %3711  ;;  %v3609_v63 = vunpack.i.h.bf16 %v5552_v9  ;;  %v6126_v33 = vunpack.i.l.bf16 %v5538_v35 }
 0x58f   : > { %v1513_v52 = vsel %vm1272_vm7, %v5580_v29, %v3658_v2  ;;  %v1957_v62 = vsel %vm1272_vm7, %v5583_v41, %v3659_v44  ;;  %v3714_v15 = vunpack.i.h.bf16 %v3712_v40  ;;  %v3713_v59 = vunpack.i.l.bf16 %v3712_v40 }
 0x590   : > { %v1514_v23 = vsel %vm1274_vm8, %v1513_v52, %v6122_v19  ;;  %v1958_v58 = vsel %vm1274_vm8, %v1957_v62, %v6123_v30  ;;  %v3662_v6 = vpop.permute.xlu0 %3661  ;;  %v6125_v29 = vunpack.i.h.bf16 %v5522_v22  ;;  %v3593_v22 = vunpack.i.l.bf16 %v5550_v11 }
 0x591   : > { %v3664_v48 = vunpack.i.h.bf16 %v3662_v6  ;;  %v3663_v32 = vunpack.i.l.bf16 %v3662_v6  ;;  %v1284_v5 = vsel %vm1276_vm9, %v1283_v54, %v3713_v59  ;;  %v3608_v44 = vunpack.i.l.bf16 %v5552_v9 }
 0x592   : > { %v1751_v41 = vsel %vm1274_vm8, %v1750_v53, %v6125_v29  ;;  %v3722_v49 = vpop.permute.xlu1 %3721  ;;  %v3142_v57 = vsel %vm386_vm1, %v1284_v5, %v3120_v28  ;;  %v1515_v14 = vsel %vm1276_vm9, %v1514_v23, %v3688_v46  ;;  %v1959_v52 = vsel %vm1276_vm9, %v1958_v58, %v3689_v0 }
 0x593   : > { %v1752_v7 = vsel %vm1276_vm9, %v1751_v41, %v3714_v15  ;;  %v2873_v62 = vsel %vm1265_vm3, %v5308_v26, %v3664_v48  ;;  %v2421_v31 = vsel %vm1265_vm3, %v5324_v10, %v3663_v32  ;;  %v1275_v61 = vsel %vm1274_vm8, %v1273_v24, %v6126_v33 }
 0x594   : > { %v3144_v55 = vsel %vm386_vm1, %v1752_v7, %v3126_v16  ;;  %v3692_v2 = vpop.permute.xlu0 %3691  ;;  %v6127_v9 = vunpack.i.h.bf16 %v5538_v35  ;;  %v3724_v40 = vunpack.i.h.bf16 %v3722_v49  ;;  %v3723_v19 = vunpack.i.l.bf16 %v3722_v49 }
 0x595   : > { %v3432_v42 = vpack.c.bf16 %v3144_v55, %v3142_v57  ;;  %v3694_v60 = vunpack.i.h.bf16 %v3692_v2  ;;  %v3693_v53 = vunpack.i.l.bf16 %v3692_v2  ;;  %v6128_v23 = vunpack.i.h.bf16 %v5546_v1 }
 0x596   : > { %v1744_v25 = vsel %vm1274_vm8, %v1743_v20, %v6127_v9  ;;  %v3732_v46 = vpop.permute.xlu1 %3731  ;;  %v3119_v58 = vrot.slane %v1515_v14, 4  ;;  %v3125_v15 = vrot.slane %v1959_v52, 4  ;;  %v6130_v29 = vunpack.i.h.bf16 %v5540_v21 }
 0x597   : > { %3433 = vmatprep.subr.bf16.mxu1 %v3432_v42  ;;  %v2635_v0 = vsel %vm1265_vm3, %v5345_v43, %v3694_v60  ;;  %v2191_v26 = vsel %vm1265_vm3, %v5334_v39, %v3693_v53  ;;  %v6129_v39 = vunpack.i.l.bf16 %v5540_v21  ;;  %v6131_v1 = vunpack.i.l.bf16 %v5544_v56 }
 0x598   : > { %v2192_v10 = vsel %vm1267_vm4, %v2191_v26, %v3588_v47  ;;  %v2636_v30 = vsel %vm1267_vm4, %v2635_v0, %v6128_v23  ;;  %v3702_v35 = vpop.permute.xlu0 %3701  ;;  %v2874_v47 = vsel %vm1267_vm4, %v2873_v62, %v6130_v29  ;;  %v6132_v28 = vunpack.i.h.bf16 %v5544_v56 }
 0x599   : > { %v3704_v59 = vunpack.i.h.bf16 %v3702_v35  ;;  %v3703_v6 = vunpack.i.l.bf16 %v3702_v35  ;;  %v2193_v50 = vsel %vm1269_vm5, %v2192_v10, %v3723_v19  ;;  %v2637_v43 = vsel %vm1269_vm5, %v2636_v30, %v3724_v40 }
 0x59a   : > { %v2422_v54 = vsel %vm1267_vm4, %v2421_v31, %v6129_v39  ;;  %v2194_v41 = vsel %vm540_vm6, %v2193_v50, %v6131_v1  ;;  %v2638_v16 = vsel %vm540_vm6, %v2637_v43, %v6132_v28  ;;  %v3734_v48 = vunpack.i.h.bf16 %v3732_v46  ;;  %v3742_v49 = vpop.permute.xlu1 %3741 }
 0x59b   : > { %v3733_v32 = vunpack.i.l.bf16 %v3732_v46  ;;  %v2423_v5 = vsel %vm1269_vm5, %v2422_v54, %v3703_v6  ;;  %v2875_v7 = vsel %vm1269_vm5, %v2874_v47, %v3704_v59  ;;  %v3744_v55 = vunpack.i.h.bf16 %v3742_v49 }
 0x59c   : > { %v2424_v57 = vsel %vm540_vm6, %v2423_v5, %v3593_v22  ;;  %v2876_v21 = vsel %vm540_vm6, %v2875_v7, %v3594_v4  ;;  %v3743_v24 = vunpack.i.l.bf16 %v3742_v49  ;;  %v3717_v20 = vpop.permute.xlu0 %3716  ;;  %v6133_v11 = vunpack.i.h.bf16 %v5548_v37 }
 0x59d   : > { %v3719_v2 = vunpack.i.h.bf16 %v3717_v20  ;;  %v3718_v56 = vunpack.i.l.bf16 %v3717_v20  ;;  %v2425_v42 = vsel %vm1272_vm7, %v2424_v57, %v3733_v32  ;;  %v2877_v60 = vsel %vm1272_vm7, %v2876_v21, %v3734_v48 }
 0x59e   : > { %v2195_v53 = vsel %vm1272_vm7, %v2194_v41, %v3743_v24  ;;  %v2639_v14 = vsel %vm1272_vm7, %v2638_v16, %v3744_v55  ;;  %v2426_v22 = vsel %vm1274_vm8, %v2425_v42, %v3603_v8  ;;  %v2878_v4 = vsel %vm1274_vm8, %v2877_v60, %v6133_v11  ;;  %v3752_v52 = vpop.permute.xlu1 %3751 }
 0x59f   : > { %v1277_v62 = vsel %vm1276_vm9, %v1275_v61, %v3718_v56  ;;  %v1745_v31 = vsel %vm1276_vm9, %v1744_v25, %v3719_v2  ;;  %v2196_v33 = vsel %vm1274_vm8, %v2195_v53, %v3608_v44  ;;  %v2640_v9 = vsel %vm1274_vm8, %v2639_v14, %v3609_v63 }
 0x5a0   : > { %v5766_v40 = vpop.permute.xlu0 %3726  ;;  %v3141_v19 = vsel %vm386_vm1, %v1277_v62, %v3119_v58  ;;  %v3143_v0 = vsel %vm386_vm1, %v1745_v31, %v3125_v15  ;;  %v3754_v46 = vunpack.i.h.bf16 %v3752_v52  ;;  %v3753_v61 = vunpack.i.l.bf16 %v3752_v52 }
 0x5a1   : > { %v3434_v8 = vpack.c.bf16 %v3143_v0, %v3141_v19  ;;  %v3669_v49 = vunpack.i.h.bf16 %v5560_v27  ;;  %v3699_v57 = vunpack.i.h.bf16 %v5639_v13  ;;  %v3698_v21 = vunpack.i.l.bf16 %v5639_v13 }
 0x5a2   : > { %v5770_v26 = vpop.permute.xlu1 %3080  ;;  %v2427_v63 = vsel %vm1276_vm9, %v2426_v22, %v3753_v61  ;;  %v2879_v44 = vsel %vm1276_vm9, %v2878_v4, %v3754_v46  ;;  %v3668_v42 = vunpack.i.l.bf16 %v5560_v27  ;;  %v3709_v60 = vunpack.i.h.bf16 %v5661_v38 }
 0x5a3   : > { %3435 = vmatpush1.bf16.msra.mxu1 %v3434_v8  ;;  %v3131_v15 = vrot.slane %v2427_v63, 4  ;;  %v3137_v59 = vrot.slane %v2879_v44, 4  ;;  %v3708_v4 = vunpack.i.l.bf16 %v5661_v38  ;;  %v3728_v19 = vunpack.i.l.bf16 %v5766_v40 }
 0x5a4   : > { %v5772_v37 = vpop.permute.xlu0 %3736 }
 0x5a6   : > { %v5774_v10 = vpop.permute.xlu1 %3088 }
 0x5a8   : > { %v5776_v25 = vpop.permute.xlu0 %3746 }
 0x5aa   : > { %v3762_v23 = vpop.permute.xlu1 %3761 }
 0x5ab   : > { %v3764_v28 = vunpack.i.h.bf16 %v3762_v23  ;;  %v3763_v16 = vunpack.i.l.bf16 %v3762_v23 }
 0x5ac   : > { %v3757_v30 = vpop.permute.xlu0 %3756 }
 0x5ad   : > { %v3759_v35 = vunpack.i.h.bf16 %v3757_v30  ;;  %v3758_v58 = vunpack.i.l.bf16 %v3757_v30  ;;  %v2880_v55 = vsel %vm1265_vm3, %v5413_v18, %v3764_v28  ;;  %v2428_v24 = vsel %vm1265_vm3, %v5417_v17, %v3763_v16 }
 0x5ae   : > { %v3777_v43 = vpop.permute.xlu1 %3776  ;;  %v2881_v52 = vsel %vm1267_vm4, %v2880_v55, %v3669_v49 }
 0x5af   : > { %v2197_v6 = vsel %vm1276_vm9, %v2196_v33, %v3758_v58  ;;  %v2641_v50 = vsel %vm1276_vm9, %v2640_v9, %v3759_v35  ;;  %v3779_v18 = vunpack.i.h.bf16 %v3777_v43  ;;  %v3778_v22 = vunpack.i.l.bf16 %v3777_v43 }
 0x5b0   : > { %v3049_v39 = vpop.permute.xlu0 %3048  ;;  %v5783_v54 = vsel %vm386_vm1, %v2197_v6, %v3131_v15  ;;  %v5786_v29 = vsel %vm386_vm1, %v2641_v50, %v3137_v59  ;;  %v3739_v43 = vunpack.i.h.bf16 %v5772_v37 }
 0x5b1   : > { %v3438_v47 = vpack.c.bf16 %v5786_v29, %v5783_v54  ;;  %v3103_v28 = vsel %vm1265_vm3, %v5443_v12, %v3049_v39 }
 0x5b2   : > { %v3782_v1 = vpop.permute.xlu1 %3781 }
 0x5b3   : > { %v3783_v0 = vunpack.i.l.bf16 %v3782_v1  ;;  %v3784_v61 = vunpack.i.h.bf16 %v3782_v1  ;;  %v3749_v1 = vunpack.i.h.bf16 %v5776_v25 }
 0x5b4   : > { %v5790_v41 = vpop.permute.xlu0 %3056 }
 0x5b6   : > { %v5792_v48 = vpop.permute.xlu1 %3096 }
 0x5b8   : > { %v3767_v32 = vpop.permute.xlu0 %3766 }
 0x5b9   : > { %v3769_v5 = vunpack.i.h.bf16 %v3767_v32  ;;  %v3768_v7 = vunpack.i.l.bf16 %v3767_v32 }
 0x5ba   : > { %v3797_v56 = vpop.permute.xlu1 %3796 }
 0x5bb   : > { %v2642_v20 = vsel %vm1265_vm3, %v5467_v36, %v3769_v5  ;;  %v2198_v2 = vsel %vm1265_vm3, %v5456_v45, %v3768_v7  ;;  %v3729_v36 = vunpack.i.h.bf16 %v5766_v40  ;;  %v2429_v45 = vsel %vm1267_vm4, %v2428_v24, %v3668_v42 }
 0x5bc   : > { %v2643_v53 = vsel %vm1267_vm4, %v2642_v20, %v3699_v57  ;;  %v2199_v13 = vsel %vm1267_vm4, %v2198_v2, %v3698_v21  ;;  %v3772_v14 = vpop.permute.xlu0 %3771  ;;  %v3738_v40 = vunpack.i.l.bf16 %v5772_v37  ;;  %v3798_v24 = vunpack.i.l.bf16 %v3797_v56 }
 0x5bd   : > { %v3774_v11 = vunpack.i.h.bf16 %v3772_v14  ;;  %v3773_v17 = vunpack.i.l.bf16 %v3772_v14  ;;  %v2200_v33 = vsel %vm1269_vm5, %v2199_v13, %v3778_v22  ;;  %v2644_v9 = vsel %vm1269_vm5, %v2643_v53, %v3779_v18 }
 0x5be   : > { %v3077_v31 = vpop.permute.xlu1 %3076  ;;  %v2201_v30 = vsel %vm540_vm6, %v2200_v33, %v3728_v19  ;;  %v2645_v35 = vsel %vm540_vm6, %v2644_v9, %v3729_v36  ;;  %v3104_v14 = vsel %vm1267_vm4, %v3103_v28, %v5556_v51 }
 0x5bf   : > { %v2882_v27 = vsel %vm1269_vm5, %v2881_v52, %v3774_v11  ;;  %v2430_v62 = vsel %vm1269_vm5, %v2429_v45, %v3773_v17  ;;  %v3110_v23 = vsel %vm1265_vm3, %v5489_v3, %v3077_v31  ;;  %v3748_v3 = vunpack.i.l.bf16 %v5776_v25 }
 0x5c0   : > { %v2883_v38 = vsel %vm540_vm6, %v2882_v27, %v3709_v60  ;;  %v2431_v8 = vsel %vm540_vm6, %v2430_v62, %v3708_v4  ;;  %v3787_v46 = vpop.permute.xlu0 %3786  ;;  %v3111_v32 = vsel %vm1267_vm4, %v3110_v23, %v5770_v26  ;;  %v3799_v25 = vunpack.i.h.bf16 %v3797_v56 }
 0x5c1   : > { %v3789_v63 = vunpack.i.h.bf16 %v3787_v46  ;;  %v3788_v44 = vunpack.i.l.bf16 %v3787_v46  ;;  %v2432_v58 = vsel %vm1272_vm7, %v2431_v8, %v3783_v0  ;;  %v2884_v50 = vsel %vm1272_vm7, %v2883_v38, %v3784_v61 }
 0x5c2   : > { %v3085_v6 = vpop.permute.xlu1 %3084  ;;  %v2433_v49 = vsel %vm1274_vm8, %v2432_v58, %v3738_v40  ;;  %v2885_v55 = vsel %vm1274_vm8, %v2884_v50, %v3739_v43  ;;  %v3105_v11 = vsel %vm1269_vm5, %v3104_v14, %v5790_v41 }
 0x5c3   : > { %v2202_v15 = vsel %vm1272_vm7, %v2201_v30, %v3788_v44  ;;  %v2646_v59 = vsel %vm1272_vm7, %v2645_v35, %v3789_v63  ;;  %v3112_v37 = vsel %vm1269_vm5, %v3111_v32, %v3085_v6  ;;  %v3106_v45 = vsel %vm540_vm6, %v3105_v11, %v5558_v34 }
 0x5c4   : > { %v3792_v16 = vpop.permute.xlu0 %3791  ;;  %v2203_v57 = vsel %vm1274_vm8, %v2202_v15, %v3748_v3  ;;  %v2647_v21 = vsel %vm1274_vm8, %v2646_v59, %v3749_v1  ;;  %v3113_v60 = vsel %vm540_vm6, %v3112_v37, %v5774_v10  ;;  %vm3156_vm6 = vcmask 293888  }
 0x5c5   : > { %v3794_v5 = vunpack.i.h.bf16 %v3792_v16  ;;  %v3793_v7 = vunpack.i.l.bf16 %v3792_v16  ;;  %v2204_v53 = vsel %vm1276_vm9, %v2203_v57, %v3798_v24  ;;  %v2648_v13 = vsel %vm1276_vm9, %v2647_v21, %v3799_v25 }
 0x5c6   : > { %v3093_v20 = vpop.permute.xlu1 %3092 }
 0x5c7   : > { %v2434_v12 = vsel %vm1276_vm9, %v2433_v49, %v3793_v7  ;;  %v2886_v39 = vsel %vm1276_vm9, %v2885_v55, %v3794_v5  ;;  %v3114_v56 = vsel %vm1272_vm7, %v3113_v60, %v3093_v20 }
 0x5c8   : > { %v3132_v26 = vrot.slane %v2434_v12, 4  ;;  %v3138_v2 = vrot.slane %v2886_v39, 4  ;;  %v3065_v42 = vpop.permute.xlu0 %3064  ;;  %v3115_v10 = vsel %vm1274_vm8, %v3114_v56, %v5792_v48  ;;  %v3149_v48 = vld [vmem:[%s5924_s5] sm:$0xf] }
 0x5c9   : > { %v3107_v41 = vsel %vm1272_vm7, %v3106_v45, %v3065_v42 }
 0x5ca   : > { %v3146_v18 = vsel %vm386_vm1, %v2204_v53, %v3132_v26  ;;  %v3148_v22 = vsel %vm386_vm1, %v2648_v13, %v3138_v2  ;;  %v3101_v17 = vpop.permute.xlu1 %3100 }
 0x5cb   : > { %v3436_v4 = vpack.c.bf16 %v3148_v22, %v3146_v18  ;;  %v3116_v51 = vsel %vm1276_vm9, %v3115_v10, %v3101_v17 }
 0x5cc   : > { %v3069_v36 = vpop.permute.xlu0 %3068 }
 0x5cd   : > { %3437 = vmatprep.subr.bf16.mxu1 %v3436_v4  ;;  %v3108_v52 = vsel %vm1274_vm8, %v3107_v41, %v3069_v36 }
 0x5ce   : > { %3439 = vmatpush1.bf16.msra.mxu1 %v3438_v47 }
 0x5cf   : > { %3405 = vmatprep.subr.msk.mxu1 %vm386_vm1, %v3116_v51 }
 0x5d0   : > { %v3073_v27 = vpop.permute.xlu0 %3072 }
 0x5d1   : > { %v3109_v34 = vsel %vm1276_vm9, %v3108_v52, %v3073_v27 }
 0x5d2   : > { %3406 = vmatpush1.msk.msra.mxu1 %vm386_vm1, %v3109_v34 }
 0x5d3   : > { %3407 = vmatmul.mubr.msk.f32.vlgmr.msra.gmra.mrb[0].mxu1 %vm3156_vm6, %v3149_v48 }
 0x5db   : > { %v3154_v54 = vpop.permute.xlu1 %3153 }
 0x6a6   : > { %v3232_v29 = vpop.f32.mrb[0].mxu1 }
 0x6a7   : > { %v3233_v47 = vadd.f32 %v3232_v29, %v3154_v54  ;;  %v3234_v62 = vpop.f32.mrb[1].mxu1 }
 0x6a8   : > { %v3235_v31 = vadd.f32 %v3234_v62, %v3154_v54 }
 0x6aa   : > { %v3239_v33 = vcombine.low %v3233_v47, %v3235_v31 }
 0x6ac   : > { %3241 = vst [vmem:[%s372_s11] sm:$0xff] %v3239_v33 }
 0x6ad   : > { %3935 = shalt.err (!%p3932_p6)
}
 0x6ae   : > { %s3936_s13 = scalar_lea.hbm %s5875_s14, 128  ;;  %s3940_s20 = scalar_lea.hbm %s5926_s7, 256 }
 0x6af   : > { %p3937_p8 = scmp.ne.s32.totalorder %s5875_s14, %s3936_s13  ;;  %p3941_p11 = scmp.lt.u32.totalorder %s5875_s14, %s5926_s7 }
 0x6b0   : > { %p3942_p0 = scmp.lt.u32.totalorder %s3940_s20, %s3936_s13  ;;  %p3944_p13 = scmp.lt.u32.totalorder %s3936_s13, %s5875_s14 }
 0x6b1   : > { %p3938_p4 = pnand %p3937_p8, %p6134_p3 }
 0x6b2   : > { %p3943_p10 = por %p3942_p0, %p3941_p11 }
 0x6b3   : > { %p3939_p12 = pneg %p3938_p4 }
 0x6b4   : > { %p3945_p7 = por %p3944_p13, %p3943_p10 }
 0x6b6   : > { %p3946_p9 = pnand %p3945_p7, %p3939_p12 }
 0x6b8   : > { %3949 = shalt.err (!%p3946_p9)
}
 0x6b9   : > { %3448 = dma.vmem_to_hbm [thread:$0]  (%p6134_p3), %s5877_s15, 128, %s5875_s14, %s3243_s9  }
 0x6ba PF: > { %s3269_s26 = sand.u32 1, %s3984_s24   ;;  %p6135_p2 = scmp.ne.s32.totalorder %s5984_s8, 0 }
 0x6bb   : > { %p6136_p5 = scmp.ge.s32.totalorder %s3996_s27, 2  ;;  %s3270_s22 = scalar_lea.sflag [#allocation5], %s3269_s26 }
 0x6bd   : > { %p3462_p1 = pnand %p6136_p5, %p6135_p2 }
 0x6bf   : > { %3979 = dma.done.wait (!%p3462_p1), %s3270_s22, 128  }
 0x6c0   : > { %3981 = vsyncadd (!%p3462_p1), %s3270_s22, 4294967168  ;;  %s6137_s27 = sld [smem:[#allocation15_spill]]  ;;  %s6138_s30 = sld [smem:[#allocation14_spill]] }
 0x6c1   : > { %s6139_s26 = sld [smem:[#allocation16_spill]]  ;;  %s6140_s24 = smov %s3988_s25 }
 0x6c6   : > { %p23_p6 = scmp.ge.s32.totalorder %s6137_s27, 4   ;;  %s6141_s25 = smov %s6138_s30 }
 0x6c8   :  { %25 = sbr.rel (!%p23_p6) target bundleno = 9 (0x9), region = 116 }
 0x6cf   :  { %3275 = vsyncpa [#allocation4], 1 }
 0x6d0   :  { %3277 = vsyncpa [#allocation4 + $0x1], 1 }
 0x6d1   :  { %3278 = vsyncpa [#allocation7], 1 }
 0x6d2   :  { %3280 = vsyncpa [#allocation7 + $0x1], 1 }
 0x6d3   :  { %3281 = vsyncpa [#allocation5], 1 }
 0x6d4   :  { %3283 = vsyncpa [#allocation5 + $0x1], 1 }

</bundles_post_ra>
